<compile_context>
chip_gen: v7x
topology: tpu7x:2x2x1
jax: 0.10.0
libtpu: 0.0.40
codegen_flags: <defaults>
</compile_context>

<pallas_src>
import functools

import jax
import jax.numpy as jnp
from jax import lax
from jax.experimental import pallas as pl
from jax.experimental.pallas import tpu as pltpu

CLASSES = 40
IN_FEATURES = 112 * 92  # 10304


def _round_up(x, m):
    return (x + m - 1) // m * m


def _linear_kernel(x_ref, w_ref, b_ref, o_ref):
    # x_ref: (TB, F) f32, w_ref: (C, F) f32, b_ref: (1, C) f32, o_ref: (TB, C)
    acc = lax.dot_general(
        x_ref[...], w_ref[...],
        dimension_numbers=(((1,), (1,)), ((), ())),   # x @ W.T
        preferred_element_type=jnp.float32,
    )
    o_ref[...] = acc + b_ref[...]


@functools.partial(jax.jit, static_argnames=("tb",))
def net_forward(x, weight, bias, *, tb=256):
    """x: (B, IN_FEATURES) f32; weight: (CLASSES, IN_FEATURES) f32 (PyTorch
    layout); bias: (CLASSES,) f32. Returns (B, CLASSES) f32."""
    B, F = x.shape
    C = weight.shape[0]
    b2 = bias.reshape(1, C)

    # Batch tile: full batch if small, else TB=256 (sized so double-buffered
    # f32 x tiles + resident W fit v7x's 64 MiB VMEM / default scoped limits).
    TB = min(tb, B)
    n_tiles = pl.cdiv(B, TB)
    Bp = n_tiles * TB
    if Bp != B:
        x = jnp.pad(x, ((0, Bp - B), (0, 0)))

    dtype_bytes = 4
    Fp = _round_up(F, 128)   # lane padding of x's / W's last dim
    Cp = _round_up(C, 128)   # lane padding of the output's last dim
    # Double-buffer budget: 2x x tiles + 2x out tiles + (conservatively 2x)
    # resident weight + bias + headroom.
    vmem_bytes = (
        2 * TB * Fp * dtype_bytes
        + 2 * TB * Cp * dtype_bytes
        + 2 * _round_up(C, 8) * Fp * dtype_bytes
        + 8 * Cp * dtype_bytes
        + (4 << 20)
    )
    vmem_bytes = min(vmem_bytes, 64 << 20)

    out = pl.pallas_call(
        _linear_kernel,
        out_shape=jax.ShapeDtypeStruct((Bp, C), jnp.float32),
        grid=(n_tiles,),
        in_specs=[
            pl.BlockSpec((TB, F), lambda i: (i, 0)),   # x: streamed per tile
            pl.BlockSpec((C, F), lambda i: (0, 0)),    # W: VMEM-resident
            pl.BlockSpec((1, C), lambda i: (0, 0)),    # bias: VMEM-resident
        ],
        out_specs=pl.BlockSpec((TB, C), lambda i: (i, 0)),
        compiler_params=pltpu.CompilerParams(
            dimension_semantics=("parallel",),
            vmem_limit_bytes=int(vmem_bytes),
        ),
        cost_estimate=pl.CostEstimate(
            flops=2 * Bp * F * C,
            bytes_accessed=(Bp * F + C * F + Bp * C) * dtype_bytes,
            transcendentals=0,
        ),
    )(x, weight, b2)

    return out[:B] if Bp != B else out


def init_params(key):
    # Deterministic init mirroring PyTorch nn.Linear default:
    # U(-1/sqrt(in_features), 1/sqrt(in_features)) for both weight and bias.
    kw, kb = jax.random.split(key)
    bound = 1.0 / jnp.sqrt(jnp.float32(IN_FEATURES))
    weight = jax.random.uniform(
        kw, (CLASSES, IN_FEATURES), jnp.float32, minval=-bound, maxval=bound)
    bias = jax.random.uniform(
        kb, (CLASSES,), jnp.float32, minval=-bound, maxval=bound)
    return weight, bias


if __name__ == "__main__":
    key = jax.random.PRNGKey(0)
    k_x, k_x2, k_p = jax.random.split(key, 3)

    weight, bias = init_params(k_p)

    # Small batch (single-tile path).
    B = 2
    x = jax.random.normal(k_x, (B, IN_FEATURES), jnp.float32)
    out = jax.block_until_ready(net_forward(x, weight, bias))
    ref = x @ weight.T + bias
    assert out.shape == (B, CLASSES)
    assert jnp.allclose(out, ref, atol=1e-4, rtol=1e-4)

    # Larger, non-multiple-of-tile batch (exercises the grid + padding path).
    B2 = 300
    x2 = jax.random.normal(k_x2, (B2, IN_FEATURES), jnp.float32)
    out2 = jax.block_until_ready(net_forward(x2, weight, bias))
    ref2 = x2 @ weight.T + bias
    assert out2.shape == (B2, CLASSES)
    assert jnp.allclose(out2, ref2, atol=1e-4, rtol=1e-4)

    print("KERNEL_OK")
</pallas_src>

<mosaic_0001>
module attributes {stable_mosaic.version = 11 : i64} {
  func.func @_linear_kernel(%arg0: i32, %arg1: memref<2x10304xf32, #tpu.memory_space<vmem>>, %arg2: memref<40x10304xf32, #tpu.memory_space<vmem>>, %arg3: memref<1x40xf32, #tpu.memory_space<vmem>>, %arg4: memref<2x40xf32, #tpu.memory_space<vmem>>) attributes {dimension_semantics = [#tpu.dimension_semantics<parallel>], iteration_bounds = array<i64: 1>, scalar_prefetch = 0 : i64, scratch_operands = 0 : i64, tpu.core_type = #tpu.core_type<tc>, window_params = [{transform_indices = @transform_0, window_bounds = array<i64: 2, 10304>}, {pipeline_mode = #tpu.pipeline_mode<synchronous>, transform_indices = @transform_1, window_bounds = array<i64: 40, 10304>}, {pipeline_mode = #tpu.pipeline_mode<synchronous>, transform_indices = @transform_2, window_bounds = array<i64: 1, 40>}, {transform_indices = @transform_3, window_bounds = array<i64: 2, 40>}]} {
    %c0 = arith.constant 0 : index
    %c0_0 = arith.constant 0 : index
    %0 = vector.load %arg1[%c0, %c0_0] : memref<2x10304xf32, #tpu.memory_space<vmem>>, vector<2x10304xf32>
    %c0_1 = arith.constant 0 : index
    %c0_2 = arith.constant 0 : index
    %1 = vector.load %arg2[%c0_1, %c0_2] : memref<40x10304xf32, #tpu.memory_space<vmem>>, vector<40x10304xf32>
    %cst = arith.constant dense<0.000000e+00> : vector<2x40xf32>
    %2 = tpu.matmul %0, %1, %cst {dimension_numbers = #tpu.dot_dimension_numbers<[1], [1], [0], [0], [0, 0, 1, 0], [], []>} : vector<2x10304xf32>, vector<40x10304xf32>, vector<2x40xf32> -> vector<2x40xf32>
    %c0_3 = arith.constant 0 : index
    %c0_4 = arith.constant 0 : index
    %3 = vector.load %arg3[%c0_3, %c0_4] : memref<1x40xf32, #tpu.memory_space<vmem>>, vector<1x40xf32>
    %4 = vector.broadcast %3 : vector<1x40xf32> to vector<2x40xf32>
    %5 = arith.addf %2, %4 : vector<2x40xf32>
    %c0_5 = arith.constant 0 : index
    %c0_6 = arith.constant 0 : index
    %6 = vector.load %arg4[%c0_5, %c0_6] : memref<2x40xf32, #tpu.memory_space<vmem>>, vector<2x40xf32>
    tpu.vector_store %arg4[%c0_5, %c0_6], %5 {strides = array<i32>} : memref<2x40xf32, #tpu.memory_space<vmem>>, vector<2x40xf32>,
    return
  }
  func.func @transform_0(%arg0: i32) -> (i32, i32) {
    %c0_i32 = arith.constant 0 : i32
    %c0_i32_0 = arith.constant 0 : i32
    return %arg0, %c0_i32 : i32, i32
  }
  func.func @transform_1(%arg0: i32) -> (i32, i32) {
    %c0_i32 = arith.constant 0 : i32
    %c0_i32_0 = arith.constant 0 : i32
    %c0_i32_1 = arith.constant 0 : i32
    return %c0_i32, %c0_i32_0 : i32, i32
  }
  func.func @transform_2(%arg0: i32) -> (i32, i32) {
    %c0_i32 = arith.constant 0 : i32
    %c0_i32_0 = arith.constant 0 : i32
    %c0_i32_1 = arith.constant 0 : i32
    return %c0_i32, %c0_i32_0 : i32, i32
  }
  func.func @transform_3(%arg0: i32) -> (i32, i32) {
    %c0_i32 = arith.constant 0 : i32
    %c0_i32_0 = arith.constant 0 : i32
    return %arg0, %c0_i32 : i32, i32
  }
}

</mosaic_0001>

<bundles_post_ra>
// kernel: net_forward.1
= control target key start
LH: loop header
LB: loop body
LE: loop exit
PB: predicated region body
PF: predicated region fallthrough
CT: control target
= control target key end

     0   :  { %8 = vsyncpa [#allocation3], 0  ;;  %s4702_s0 = inlined_call_operand.hbm [shape: f32[2,10304], index: 0, kind: input, shape index: {}]   ;;  %s4703_s1 = inlined_call_operand.hbm [shape: f32[40,10304], index: 1, kind: input, shape index: {}]   ;;  %s4704_s2 = inlined_call_operand.hbm [shape: f32[1,40], index: 2, kind: input, shape index: {}]   ;;  %s4705_s3 = inlined_call_operand.hbm [shape: f32[2,40], index: 3, kind: output, shape index: {}]  }
   0x1   :  { %9 = vsyncpa [#allocation6], 0 }
   0x2   :  { %10 = vsyncpa [#allocation4], 0  ;;  %s4398_s12 = smov [#allocation5]   ;;  %s4304_s16 = scalar_lea.hbm %s4703_s1, 51840 }
   0x3   :  { %s26_s13 = sshll.u32 %s4398_s12, 4  ;;  %p4305_p0 = scmp.ne.s32.totalorder %s4703_s1, %s4304_s16  ;;  %s27_s13 = int_to_ptr.vmem [resolvable:$true] %s26_s13 }
   0x4   :  { %p4308_p1 = scmp.lt.u32.totalorder %s4304_s16, %s4703_s1 }
   0x6   :  { %p4310_p2 = pnand %p4308_p1, %p4305_p0 }
   0x8   :  { %4313 = shalt.err (!%p4310_p2)
}
   0x9   :  { %s4314_s21 = scalar_lea.vmem %s27_s13, 51840  ;;  %p4319_p4 = scmp.lt.s32.totalorder %s27_s13, %s27_s13 }
   0xa   :  { %p4315_p3 = scmp.ne.s32.totalorder %s27_s13, %s4314_s21  ;;  %p4320_p5 = scmp.lt.s32.totalorder %s4314_s21, %s4314_s21 }
   0xc   :  { %p4321_p6 = por %p4320_p5, %p4319_p4 }
   0xe   :  { %p4322_p7 = pnand %p4321_p6, %p4315_p3 }
  0x10   :  { %4325 = shalt.err (!%p4322_p7)
}
  0x11   :  { %s4399_s22 = smov 10368   ;;  %s4400_s23 = smov 648  }
  0x12   :  { %32 = dma.hbm_to_vmem [thread:$0]  %s4703_s1, 51840, %s27_s13, [#allocation6], %s4399_s22, %s4399_s22, %s4400_s23  }
  0x13   :  { %s4401_s26 = smov [#allocation2]   ;;  %s4402_s28 = smov [#allocation7]  }
  0x14   :  { %s17_s27 = sshll.u32 %s4401_s26, 4  ;;  %s39_s29 = sshll.u32 %s4402_s28, 4  ;;  %s18_s27 = int_to_ptr.vmem [resolvable:$true] %s17_s27  ;;  %s40_s29 = int_to_ptr.vmem [resolvable:$true] %s39_s29 }
  0x15   :  { %s4326_s5 = scalar_lea.hbm %s4702_s0, 2592 }
  0x16   :  { %p4327_p8 = scmp.ne.s32.totalorder %s4702_s0, %s4326_s5  ;;  %p4330_p9 = scmp.lt.u32.totalorder %s4326_s5, %s4702_s0 }
  0x18   :  { %p4332_p10 = pnand %p4330_p9, %p4327_p8 }
  0x1a   :  { %4335 = shalt.err (!%p4332_p10)
}
  0x1b   :  { %s4336_s1 = scalar_lea.vmem %s18_s27, 2592  ;;  %p4341_p12 = scmp.lt.s32.totalorder %s18_s27, %s18_s27 }
  0x1c   :  { %p4337_p11 = scmp.ne.s32.totalorder %s18_s27, %s4336_s1  ;;  %p4342_p13 = scmp.lt.s32.totalorder %s4336_s1, %s4336_s1 }
  0x1e   :  { %p4343_p0 = por %p4342_p13, %p4341_p12 }
  0x20   :  { %p4344_p1 = pnand %p4343_p0, %p4337_p11 }
  0x22   :  { %4347 = shalt.err (!%p4344_p1)
}
  0x23   :  { %20 = dma.hbm_to_vmem [thread:$0]  %s4702_s0, 2592, %s18_s27, [#allocation3]  }
  0x24   :  { %s4348_s14 = scalar_lea.hbm %s4704_s2, 16 }
  0x25   :  { %p4349_p2 = scmp.ne.s32.totalorder %s4704_s2, %s4348_s14  ;;  %p4352_p3 = scmp.lt.u32.totalorder %s4348_s14, %s4704_s2 }
  0x27   :  { %p4354_p4 = pnand %p4352_p3, %p4349_p2 }
  0x29   :  { %4357 = shalt.err (!%p4354_p4)
}
  0x2a   :  { %s4358_s19 = scalar_lea.vmem %s40_s29, 16  ;;  %s4362_s20 = scalar_lea.vmem %s40_s29, 32 }
  0x2b   :  { %p4359_p5 = scmp.ne.s32.totalorder %s40_s29, %s4358_s19  ;;  %p4363_p6 = scmp.lt.s32.totalorder %s40_s29, %s40_s29 }
  0x2c   :  { %p4364_p7 = scmp.lt.s32.totalorder %s4362_s20, %s4358_s19 }
  0x2e   :  { %p4365_p8 = por %p4364_p7, %p4363_p6 }
  0x30   :  { %p4366_p9 = pnand %p4365_p8, %p4359_p5 }
  0x32   :  { %4369 = shalt.err (!%p4366_p9)
}
  0x33   :  { %42 = dma.hbm_to_vmem [thread:$0]  %s4704_s2, 16, %s40_s29, [#allocation6]  }
  0x34   :  { %4392 = dma.done.wait [#allocation3], 2592  }
  0x35   :  { %4393 = vsyncadd [#allocation3], 4294964704 }
  0x36   :  { %4394 = dma.done.wait [#allocation6], 51856  }
  0x37   :  { %4395 = vsyncadd [#allocation6], 4294915440  ;;  %v4403_v0 = vmov 1983009808   ;;  %v510_v2 = vlaneseq  ;;  %v74_v5 = vld [vmem:[#allocation5 + $0x8] sm:$0xff]  ;;  %v155_v6 = vld [vmem:[#allocation5 + $0x290] sm:$0xff] }
  0x38   :  { %v508_v1 = vunpack.c.l.s4 %v4403_v0  ;;  %v114_v7 = vld [vmem:[#allocation5 + $0x148] sm:$0xff]  ;;  %v3866_v8 = vpack.c.bf16 %v155_v6, %v74_v5  ;;  %v195_v9 = vld [vmem:[#allocation5 + $0x3d0] sm:$0xff]  ;;  %v73_v10 = vld [vmem:[#allocation5] sm:$0xff]  ;;  %vm933_vm0 = vcmask 523264   ;;  %vm4405_vm2 = vmmov 0   ;;  %s4407_s2 = smov [#allocation8]  }
  0x39   :  { %v511_v4 = vshrl.u32 %v510_v2, 7  ;;  %v154_v11 = vld [vmem:[#allocation5 + $0x288] sm:$0xff]  ;;  %v4026_v12 = vpack.c.bf16 %v195_v9, %v114_v7  ;;  %v113_v14 = vld [vmem:[#allocation5 + $0x140] sm:$0xff]  ;;  %v236_v16 = vld [vmem:[#allocation5 + $0x518] sm:$0xff]  ;;  %s3829_s22 = sshll.u32 %s4407_s2, 4  ;;  %vm3821_vm3 = vcmask 320512   ;;  %s3830_s22 = int_to_ptr.vmem [resolvable:$true] %s3829_s22 }
  0x3a   :  { %v509_v3 = vunpack.c.0.s8 %v508_v1  ;;  %v3868_v13 = vpack.c.bf16 %v154_v11, %v73_v10  ;;  %v194_v15 = vld [vmem:[#allocation5 + $0x3c8] sm:$0xff]  ;;  %3867 = vmatprep.subr.bf16.mxu1 %v3866_v8  ;;  %v317_v18 = vld [vmem:[#allocation5 + $0x7a0] sm:$0xff]  ;;  %v276_v19 = vld [vmem:[#allocation5 + $0x658] sm:$0xff]  ;;  %s4370_s23 = scalar_lea.vmem %s3830_s22, 32  ;;  %p4375_p11 = scmp.lt.s32.totalorder %s3830_s22, %s3830_s22 }
  0x3b   :  { %v4028_v17 = vpack.c.bf16 %v194_v15, %v113_v14  ;;  %v357_v20 = vld [vmem:[#allocation5 + $0x8e0] sm:$0xff]  ;;  %4027 = vmatprep.subr.bf16.mxu0 %v4026_v12  ;;  %v3870_v22 = vpack.c.bf16 %v317_v18, %v236_v16  ;;  %v235_v24 = vld [vmem:[#allocation5 + $0x510] sm:$0xff]  ;;  %v316_v25 = vld [vmem:[#allocation5 + $0x798] sm:$0xff]  ;;  %p4371_p10 = scmp.ne.s32.totalorder %s3830_s22, %s4370_s23  ;;  %p4376_p12 = scmp.lt.s32.totalorder %s4370_s23, %s4370_s23 }
  0x3c   :  { %v4464_v21 = vsub.s32 %v509_v3, %v511_v4  ;;  %3869 = vmatpush1.bf16.xpose.msra.mxu1 %v3868_v13  ;;  %v4030_v23 = vpack.c.bf16 %v357_v20, %v276_v19  ;;  %v275_v26 = vld [vmem:[#allocation5 + $0x650] sm:$0xff]  ;;  %v356_v27 = vld [vmem:[#allocation5 + $0x8d8] sm:$0xff]  ;;  %v3872_v31 = vpack.c.bf16 %v316_v25, %v235_v24  ;;  %v398_v35 = vld [vmem:[#allocation5 + $0xa28] sm:$0xff] }
  0x3d   :  { %4029 = vmatpush1.bf16.xpose.msra.mxu0 %v4028_v17  ;;  %3871 = vmatprep.subr.bf16.mxu1 %v3870_v22  ;;  %v52_v28 = vld [vmem:[#allocation2] sm:$0xff]  ;;  %v62_v30 = vld [vmem:[#allocation2 + $0x50] sm:$0xff]  ;;  %v4032_v33 = vpack.c.bf16 %v356_v27, %v275_v26  ;;  %v4474_v12 = vld [vmem:[#allocation2 + $0x8] sm:$0xff]  ;;  %p4377_p13 = por %p4376_p12, %p4375_p11 }
  0x3e   :  { %4031 = vmatprep.subr.bf16.mxu0 %v4030_v23  ;;  %v513_v29 = vrot.slane %v52_v28, %v4464_v21  ;;  %v683_v32 = vrot.slane %v62_v30, %v4464_v21  ;;  %v438_v37 = vld [vmem:[#allocation5 + $0xb68] sm:$0xff]  ;;  %v506_v38 = vcombine.high %v52_v28, %v52_v28  ;;  %v76_v39 = vld [vmem:[#allocation5 + $0x18] sm:$0xff]  ;;  %v157_v40 = vld [vmem:[#allocation5 + $0x2a0] sm:$0xff]  ;;  %v676_v41 = vcombine.high %v62_v30, %v62_v30 }
  0x3f   :  { %v116_v42 = vld [vmem:[#allocation5 + $0x158] sm:$0xff]  ;;  %v197_v43 = vld [vmem:[#allocation5 + $0x3e0] sm:$0xff]  ;;  %v3874_v46 = vpack.c.bf16 %v157_v40, %v76_v39  ;;  %v75_v47 = vld [vmem:[#allocation5 + $0x10] sm:$0xff]  ;;  %v4480_v25 = vrot.slane %v4474_v12, %v4464_v21  ;;  %p4378_p0 = pnand %p4377_p13, %p4371_p10 }
  0x40   :  { %v521_v34 = vcombine.high %v513_v29, %v513_v29  ;;  %v691_v36 = vcombine.high %v683_v32, %v683_v32  ;;  %v397_v44 = vld [vmem:[#allocation5 + $0xa20] sm:$0xff]  ;;  %v156_v48 = vld [vmem:[#allocation5 + $0x298] sm:$0xff]  ;;  %v115_v49 = vld [vmem:[#allocation5 + $0x150] sm:$0xff]  ;;  %v4034_v50 = vpack.c.bf16 %v197_v43, %v116_v42  ;;  %v4469_v54 = vrot.slane %v506_v38, %v4464_v21 }
  0x41   :  { %v437_v45 = vld [vmem:[#allocation5 + $0xb60] sm:$0xff]  ;;  %v196_v51 = vld [vmem:[#allocation5 + $0x3d8] sm:$0xff]  ;;  %v238_v52 = vld [vmem:[#allocation5 + $0x528] sm:$0xff]  ;;  %v690_v57 = vrot.slane %v676_v41, %v4464_v21  ;;  %v3876_v58 = vpack.c.bf16 %v156_v48, %v75_v47 }
  0x42   :  { %1015 = vmatprep.mubr.f32.mxu1 %v521_v34  ;;  %2415 = vmatprep.mubr.f32.mxu0 %v691_v36  ;;  %v319_v53 = vld [vmem:[#allocation5 + $0x7b0] sm:$0xff]  ;;  %v278_v55 = vld [vmem:[#allocation5 + $0x668] sm:$0xff]  ;;  %v4036_v59 = vpack.c.bf16 %v196_v51, %v115_v49  ;;  %v522_v62 = vcombine.high %v4469_v54, %v4469_v54  ;;  %v237_v0 = vld [vmem:[#allocation5 + $0x520] sm:$0xff] }
  0x43   :  { %v359_v56 = vld [vmem:[#allocation5 + $0x8f0] sm:$0xff]  ;;  %v3878_v60 = vpack.c.bf16 %v319_v53, %v238_v52  ;;  %v692_v63 = vcombine.high %v690_v57, %v690_v57  ;;  %v318_v1 = vld [vmem:[#allocation5 + $0x7a8] sm:$0xff]  ;;  %v277_v2 = vld [vmem:[#allocation5 + $0x660] sm:$0xff] }
  0x44   :  { %3873 = vmatpush1.bf16.xpose.msra.mxu1 %v3872_v31  ;;  %v4038_v61 = vpack.c.bf16 %v359_v56, %v278_v55  ;;  %v358_v3 = vld [vmem:[#allocation5 + $0x8e8] sm:$0xff]  ;;  %v3880_v4 = vpack.c.bf16 %v318_v1, %v237_v0  ;;  %v400_v6 = vld [vmem:[#allocation5 + $0xa38] sm:$0xff]  ;;  %v159_v9 = vld [vmem:[#allocation5 + $0x2b0] sm:$0xff] }
  0x45   :  { %4033 = vmatpush1.bf16.xpose.msra.mxu0 %v4032_v33  ;;  %959 = vmatprep.subr.mxu1 %v398_v35  ;;  %v4040_v5 = vpack.c.bf16 %v358_v3, %v277_v2  ;;  %v440_v7 = vld [vmem:[#allocation5 + $0xb78] sm:$0xff]  ;;  %v78_v8 = vld [vmem:[#allocation5 + $0x28] sm:$0xff]  ;;  %v199_v11 = vld [vmem:[#allocation5 + $0x3f0] sm:$0xff]  ;;  %v538_v33 = vcombine.high %v4480_v25, %v4480_v25 }
  0x46   :  { %2359 = vmatprep.subr.mxu0 %v438_v37  ;;  %v118_v10 = vld [vmem:[#allocation5 + $0x168] sm:$0xff]  ;;  %v399_v13 = vld [vmem:[#allocation5 + $0xa30] sm:$0xff]  ;;  %v3882_v16 = vpack.c.bf16 %v159_v9, %v78_v8  ;;  %v77_v17 = vld [vmem:[#allocation5 + $0x20] sm:$0xff] }
  0x47   :  { %v439_v14 = vld [vmem:[#allocation5 + $0xb70] sm:$0xff]  ;;  %v158_v18 = vld [vmem:[#allocation5 + $0x2a8] sm:$0xff]  ;;  %v117_v19 = vld [vmem:[#allocation5 + $0x160] sm:$0xff]  ;;  %v4042_v20 = vpack.c.bf16 %v199_v11, %v118_v10 }
  0x48   :  { %v4476_v15 = vld [vmem:[#allocation2 + $0x58] sm:$0xff]  ;;  %v198_v22 = vld [vmem:[#allocation5 + $0x3e8] sm:$0xff]  ;;  %v321_v24 = vld [vmem:[#allocation5 + $0x7c0] sm:$0xff] }
  0x49   :  { %v240_v23 = vld [vmem:[#allocation5 + $0x538] sm:$0xff]  ;;  %v361_v27 = vld [vmem:[#allocation5 + $0x900] sm:$0xff]  ;;  %v700_v28 = vrot.slane %v4476_v15, %v4464_v21  ;;  %v4044_v30 = vpack.c.bf16 %v198_v22, %v117_v19  ;;  %v239_v35 = vld [vmem:[#allocation5 + $0x530] sm:$0xff]  ;;  %v693_v48 = vcombine.high %v4476_v15, %v4476_v15 }
  0x4a   :  { %v280_v26 = vld [vmem:[#allocation5 + $0x678] sm:$0xff]  ;;  %v3886_v31 = vpack.c.bf16 %v321_v24, %v240_v23  ;;  %v279_v37 = vld [vmem:[#allocation5 + $0x670] sm:$0xff]  ;;  %v402_v41 = vld [vmem:[#allocation5 + $0xa48] sm:$0xff] }
  0x4b   :  { %v708_v34 = vcombine.high %v700_v28, %v700_v28  ;;  %v320_v36 = vld [vmem:[#allocation5 + $0x7b8] sm:$0xff]  ;;  %v442_v42 = vld [vmem:[#allocation5 + $0xb88] sm:$0xff]  ;;  %v201_v47 = vld [vmem:[#allocation5 + $0x400] sm:$0xff] }
  0x4c   :  { %960 = vmatpush1.xpose.msra.mxu1 %v397_v44  ;;  %v360_v38 = vld [vmem:[#allocation5 + $0x8f8] sm:$0xff]  ;;  %v3888_v39 = vpack.c.bf16 %v320_v36, %v239_v35  ;;  %v161_v44 = vld [vmem:[#allocation5 + $0x2c0] sm:$0xff]  ;;  %v79_v52 = vld [vmem:[#allocation5 + $0x30] sm:$0xff] }
  0x4d   :  { %2360 = vmatpush1.xpose.msra.mxu0 %v437_v45  ;;  %3875 = vmatprep.subr.bf16.mxu1 %v3874_v46  ;;  %v4048_v40 = vpack.c.bf16 %v360_v38, %v279_v37  ;;  %v80_v43 = vld [vmem:[#allocation5 + $0x38] sm:$0xff]  ;;  %v523_v45 = vcombine.high %v4474_v12, %v4474_v12  ;;  %v401_v49 = vld [vmem:[#allocation5 + $0xa40] sm:$0xff]  ;;  %v362_v8 = vld [vmem:[#allocation5 + $0x908] sm:$0xff] }
  0x4e   :  { %4035 = vmatprep.subr.bf16.mxu0 %v4034_v50  ;;  %v120_v46 = vld [vmem:[#allocation5 + $0x178] sm:$0xff]  ;;  %v441_v50 = vld [vmem:[#allocation5 + $0xb80] sm:$0xff]  ;;  %v3890_v51 = vpack.c.bf16 %v161_v44, %v80_v43  ;;  %v122_v15 = vld [vmem:[#allocation5 + $0x188] sm:$0xff] }
  0x4f   :  { %1016 = vmatmul.mubr.f32.vlgmr.msra.gmra.mrb[0].mxu1 %v513_v29  ;;  %v3884_v29 = vpack.c.bf16 %v158_v18, %v77_v17  ;;  %v160_v53 = vld [vmem:[#allocation5 + $0x2b8] sm:$0xff]  ;;  %v4050_v55 = vpack.c.bf16 %v201_v47, %v120_v46  ;;  %v4498_v17 = vld [vmem:[#allocation2 + $0x10] sm:$0xff]  ;;  %v81_v23 = vld [vmem:[#allocation5 + $0x40] sm:$0xff] }
  0x50   :  { %3877 = vmatpush1.bf16.xpose.msra.mxu1 %v3876_v58  ;;  %2416 = vmatmul.mubr.f32.vlgmr.msra.gmra.mrb[0].mxu0 %v683_v32  ;;  %v4046_v32 = vpack.c.bf16 %v361_v27, %v280_v26  ;;  %v200_v56 = vld [vmem:[#allocation5 + $0x3f8] sm:$0xff]  ;;  %v323_v58 = vld [vmem:[#allocation5 + $0x7d0] sm:$0xff]  ;;  %v162_v24 = vld [vmem:[#allocation5 + $0x2c8] sm:$0xff] }
  0x51   :  { %4037 = vmatpush1.bf16.xpose.msra.mxu0 %v4036_v59  ;;  %3879 = vmatprep.subr.bf16.mxu1 %v3878_v60  ;;  %v4492_v59 = vrot.slane %v523_v45, %v4464_v21  ;;  %v282_v60 = vld [vmem:[#allocation5 + $0x688] sm:$0xff]  ;;  %v404_v11 = vld [vmem:[#allocation5 + $0xa58] sm:$0xff]  ;;  %v403_v18 = vld [vmem:[#allocation5 + $0xa50] sm:$0xff] }
  0x52   :  { %4039 = vmatprep.subr.bf16.mxu0 %v4038_v61  ;;  %1085 = vmatprep.mubr.f32.mxu1 %v522_v62  ;;  %v363_v61 = vld [vmem:[#allocation5 + $0x910] sm:$0xff]  ;;  %v707_v62 = vrot.slane %v693_v48, %v4464_v21  ;;  %v444_v12 = vld [vmem:[#allocation5 + $0xb98] sm:$0xff]  ;;  %v202_v27 = vld [vmem:[#allocation5 + $0x408] sm:$0xff] }
  0x53   :  { %2485 = vmatprep.mubr.f32.mxu0 %v692_v63  ;;  %v3892_v63 = vpack.c.bf16 %v160_v53, %v79_v52  ;;  %v4054_v2 = vpack.c.bf16 %v363_v61, %v282_v60  ;;  %v539_v3 = vcombine.high %v4492_v59, %v4492_v59  ;;  %v443_v19 = vld [vmem:[#allocation5 + $0xb90] sm:$0xff]  ;;  %v364_v43 = vld [vmem:[#allocation5 + $0x918] sm:$0xff]  ;;  %v406_v46 = vld [vmem:[#allocation5 + $0xa68] sm:$0xff] }
  0x54   :  { %v446_v47 = vld [vmem:[#allocation5 + $0xba8] sm:$0xff]  ;;  %v84_v48 = vld [vmem:[#allocation5 + $0x58] sm:$0xff]  ;;  %v205_v52 = vld [vmem:[#allocation5 + $0x420] sm:$0xff] }
  0x55   :  { %v204_v61 = vld [vmem:[#allocation5 + $0x418] sm:$0xff]  ;;  %vm4188_vm1 = vmpackc.low %vm933_vm0, %vm933_vm0 }
  0x58   :  { %3881 = vmatpush1.bf16.xpose.msra.mxu1 %v3880_v4  ;;  %v709_v4 = vcombine.high %v707_v62, %v707_v62 }
  0x59   :  { %4041 = vmatpush1.bf16.xpose.msra.mxu0 %v4040_v5  ;;  %1029 = vmatprep.subr.mxu1 %v400_v6  ;;  %v241_v5 = vld [vmem:[#allocation5 + $0x540] sm:$0xff]  ;;  %v322_v6 = vld [vmem:[#allocation5 + $0x7c8] sm:$0xff] }
  0x5a   :  { %2429 = vmatprep.subr.mxu0 %v440_v7  ;;  %v281_v7 = vld [vmem:[#allocation5 + $0x680] sm:$0xff]  ;;  %v3896_v9 = vpack.c.bf16 %v322_v6, %v241_v5 }
  0x5b   :  { %v4056_v10 = vpack.c.bf16 %v362_v8, %v281_v7 }
  0x60   :  { %1030 = vmatpush1.xpose.msra.mxu1 %v399_v13  ;;  %v82_v13 = vld [vmem:[#allocation5 + $0x48] sm:$0xff] }
  0x61   :  { %2430 = vmatpush1.xpose.msra.mxu0 %v439_v14  ;;  %3883 = vmatprep.subr.bf16.mxu1 %v3882_v16  ;;  %v163_v14 = vld [vmem:[#allocation5 + $0x2d0] sm:$0xff] }
  0x62   :  { %4043 = vmatprep.subr.bf16.mxu0 %v4042_v20  ;;  %v203_v16 = vld [vmem:[#allocation5 + $0x410] sm:$0xff]  ;;  %v4500_v20 = vld [vmem:[#allocation2 + $0x60] sm:$0xff]  ;;  %v3898_v22 = vpack.c.bf16 %v163_v14, %v82_v13  ;;  %v366_v13 = vld [vmem:[#allocation5 + $0x928] sm:$0xff] }
  0x63   :  { %1086 = vmatmul.mubr.f32.vlgmr.msra.gmra.mrb[0].mxu1 %v4469_v54  ;;  %v119_v54 = vld [vmem:[#allocation5 + $0x170] sm:$0xff]  ;;  %v4058_v26 = vpack.c.bf16 %v203_v16, %v122_v15  ;;  %v710_v53 = vcombine.high %v4500_v20, %v4500_v20  ;;  %v408_v16 = vld [vmem:[#allocation5 + $0xa78] sm:$0xff] }
  0x64   :  { %3885 = vmatpush1.bf16.xpose.msra.mxu1 %v3884_v29  ;;  %2486 = vmatmul.mubr.f32.vlgmr.msra.gmra.mrb[0].mxu0 %v690_v57  ;;  %v242_v57 = vld [vmem:[#allocation5 + $0x548] sm:$0xff]  ;;  %v4052_v0 = vpack.c.bf16 %v200_v56, %v119_v54  ;;  %v325_v29 = vld [vmem:[#allocation5 + $0x7e0] sm:$0xff] }
  0x65   :  { %4045 = vmatpush1.bf16.xpose.msra.mxu0 %v4044_v30  ;;  %3887 = vmatprep.subr.bf16.mxu1 %v3886_v31  ;;  %v3894_v1 = vpack.c.bf16 %v323_v58, %v242_v57  ;;  %v4504_v30 = vrot.slane %v4498_v17, %v4464_v21  ;;  %v284_v31 = vld [vmem:[#allocation5 + $0x698] sm:$0xff]  ;;  %v405_v54 = vld [vmem:[#allocation5 + $0xa60] sm:$0xff]  ;;  %v83_v57 = vld [vmem:[#allocation5 + $0x50] sm:$0xff] }
  0x66   :  { %4047 = vmatprep.subr.bf16.mxu0 %v4046_v32  ;;  %1155 = vmatprep.mubr.f32.mxu1 %v538_v33  ;;  %v365_v32 = vld [vmem:[#allocation5 + $0x920] sm:$0xff]  ;;  %v717_v33 = vrot.slane %v4500_v20, %v4464_v21  ;;  %v164_v58 = vld [vmem:[#allocation5 + $0x2d8] sm:$0xff]  ;;  %v126_v20 = vld [vmem:[#allocation5 + $0x1a8] sm:$0xff] }
  0x67   :  { %2555 = vmatprep.mubr.f32.mxu0 %v708_v34  ;;  %v3900_v34 = vpack.c.bf16 %v162_v24, %v81_v23  ;;  %v4062_v37 = vpack.c.bf16 %v365_v32, %v284_v31  ;;  %v555_v38 = vcombine.high %v4504_v30, %v4504_v30  ;;  %v4522_v23 = vld [vmem:[#allocation2 + $0x18] sm:$0xff]  ;;  %v206_v32 = vld [vmem:[#allocation5 + $0x428] sm:$0xff] }
  0x68   :  { %v407_v24 = vld [vmem:[#allocation5 + $0xa70] sm:$0xff] }
  0x6c   :  { %3889 = vmatpush1.bf16.xpose.msra.mxu1 %v3888_v39  ;;  %v725_v39 = vcombine.high %v717_v33, %v717_v33 }
  0x6d   :  { %4049 = vmatpush1.bf16.xpose.msra.mxu0 %v4048_v40  ;;  %1099 = vmatprep.subr.mxu1 %v402_v41  ;;  %v243_v40 = vld [vmem:[#allocation5 + $0x550] sm:$0xff]  ;;  %v324_v41 = vld [vmem:[#allocation5 + $0x7d8] sm:$0xff] }
  0x6e   :  { %2499 = vmatprep.subr.mxu0 %v442_v42  ;;  %v283_v42 = vld [vmem:[#allocation5 + $0x690] sm:$0xff]  ;;  %v3904_v44 = vpack.c.bf16 %v324_v41, %v243_v40 }
  0x6f   :  { %v4064_v45 = vpack.c.bf16 %v364_v43, %v283_v42 }
  0x74   :  { %1100 = vmatpush1.xpose.msra.mxu1 %v401_v49  ;;  %v165_v49 = vld [vmem:[#allocation5 + $0x2e0] sm:$0xff] }
  0x75   :  { %2500 = vmatpush1.xpose.msra.mxu0 %v441_v50  ;;  %3891 = vmatprep.subr.bf16.mxu1 %v3890_v51  ;;  %v540_v50 = vcombine.high %v4498_v17, %v4498_v17  ;;  %v124_v51 = vld [vmem:[#allocation5 + $0x198] sm:$0xff]  ;;  %v3906_v56 = vpack.c.bf16 %v165_v49, %v84_v48 }
  0x76   :  { %4051 = vmatprep.subr.bf16.mxu0 %v4050_v55  ;;  %v445_v55 = vld [vmem:[#allocation5 + $0xba0] sm:$0xff]  ;;  %v4066_v60 = vpack.c.bf16 %v205_v52, %v124_v51  ;;  %v448_v17 = vld [vmem:[#allocation5 + $0xbb8] sm:$0xff]  ;;  %v410_v51 = vld [vmem:[#allocation5 + $0xa88] sm:$0xff] }
  0x77   :  { %1156 = vmatmul.mubr.f32.vlgmr.msra.gmra.mrb[0].mxu1 %v4480_v25  ;;  %v121_v25 = vld [vmem:[#allocation5 + $0x180] sm:$0xff]  ;;  %v368_v48 = vld [vmem:[#allocation5 + $0x938] sm:$0xff]  ;;  %v450_v52 = vld [vmem:[#allocation5 + $0xbc8] sm:$0xff] }
  0x78   :  { %3893 = vmatpush1.bf16.xpose.msra.mxu1 %v3892_v63  ;;  %2556 = vmatmul.mubr.f32.vlgmr.msra.gmra.mrb[0].mxu0 %v700_v28  ;;  %v244_v28 = vld [vmem:[#allocation5 + $0x558] sm:$0xff]  ;;  %v4060_v35 = vpack.c.bf16 %v202_v27, %v121_v25  ;;  %v327_v63 = vld [vmem:[#allocation5 + $0x7f0] sm:$0xff] }
  0x79   :  { %4053 = vmatpush1.bf16.xpose.msra.mxu0 %v4052_v0  ;;  %3895 = vmatprep.subr.bf16.mxu1 %v3894_v1  ;;  %v3902_v36 = vpack.c.bf16 %v325_v29, %v244_v28  ;;  %v4516_v0 = vrot.slane %v540_v50, %v4464_v21  ;;  %v286_v1 = vld [vmem:[#allocation5 + $0x6a8] sm:$0xff]  ;;  %v447_v25 = vld [vmem:[#allocation5 + $0xbb0] sm:$0xff]  ;;  %v85_v28 = vld [vmem:[#allocation5 + $0x60] sm:$0xff] }
  0x7a   :  { %4055 = vmatprep.subr.bf16.mxu0 %v4054_v2  ;;  %1225 = vmatprep.mubr.f32.mxu1 %v539_v3  ;;  %v367_v2 = vld [vmem:[#allocation5 + $0x930] sm:$0xff]  ;;  %v724_v3 = vrot.slane %v710_v53, %v4464_v21  ;;  %v166_v29 = vld [vmem:[#allocation5 + $0x2e8] sm:$0xff]  ;;  %v88_v53 = vld [vmem:[#allocation5 + $0x78] sm:$0xff] }
  0x7b   :  { %2625 = vmatprep.mubr.f32.mxu0 %v709_v4  ;;  %v3908_v4 = vpack.c.bf16 %v164_v58, %v83_v57  ;;  %v4070_v7 = vpack.c.bf16 %v367_v2, %v286_v1  ;;  %v556_v8 = vcombine.high %v4516_v0, %v4516_v0  ;;  %v209_v57 = vld [vmem:[#allocation5 + $0x440] sm:$0xff]  ;;  %v208_v2 = vld [vmem:[#allocation5 + $0x438] sm:$0xff] }
  0x80   :  { %3897 = vmatpush1.bf16.xpose.msra.mxu1 %v3896_v9  ;;  %v726_v9 = vcombine.high %v724_v3, %v724_v3 }
  0x81   :  { %4057 = vmatpush1.bf16.xpose.msra.mxu0 %v4056_v10  ;;  %1169 = vmatprep.subr.mxu1 %v404_v11  ;;  %v245_v10 = vld [vmem:[#allocation5 + $0x560] sm:$0xff]  ;;  %v326_v11 = vld [vmem:[#allocation5 + $0x7e8] sm:$0xff] }
  0x82   :  { %2569 = vmatprep.subr.mxu0 %v444_v12  ;;  %v285_v12 = vld [vmem:[#allocation5 + $0x6a0] sm:$0xff]  ;;  %v3912_v14 = vpack.c.bf16 %v326_v11, %v245_v10 }
  0x83   :  { %v4072_v15 = vpack.c.bf16 %v366_v13, %v285_v12 }
  0x88   :  { %1170 = vmatpush1.xpose.msra.mxu1 %v403_v18  ;;  %v86_v18 = vld [vmem:[#allocation5 + $0x68] sm:$0xff] }
  0x89   :  { %2570 = vmatpush1.xpose.msra.mxu0 %v443_v19  ;;  %3899 = vmatprep.subr.bf16.mxu1 %v3898_v22  ;;  %v167_v19 = vld [vmem:[#allocation5 + $0x2f0] sm:$0xff] }
  0x8a   :  { %4059 = vmatprep.subr.bf16.mxu0 %v4058_v26  ;;  %v207_v22 = vld [vmem:[#allocation5 + $0x430] sm:$0xff]  ;;  %v4524_v26 = vld [vmem:[#allocation2 + $0x68] sm:$0xff]  ;;  %v3914_v27 = vpack.c.bf16 %v167_v19, %v86_v18 }
  0x8b   :  { %1226 = vmatmul.mubr.f32.vlgmr.msra.gmra.mrb[0].mxu1 %v4492_v59  ;;  %v123_v59 = vld [vmem:[#allocation5 + $0x190] sm:$0xff]  ;;  %v4074_v31 = vpack.c.bf16 %v207_v22, %v126_v20  ;;  %v727_v58 = vcombine.high %v4524_v26, %v4524_v26  ;;  %v370_v18 = vld [vmem:[#allocation5 + $0x948] sm:$0xff]  ;;  %v412_v22 = vld [vmem:[#allocation5 + $0xa98] sm:$0xff] }
  0x8c   :  { %3901 = vmatpush1.bf16.xpose.msra.mxu1 %v3900_v34  ;;  %2626 = vmatmul.mubr.f32.vlgmr.msra.gmra.mrb[0].mxu0 %v707_v62  ;;  %v246_v62 = vld [vmem:[#allocation5 + $0x568] sm:$0xff]  ;;  %v4068_v5 = vpack.c.bf16 %v204_v61, %v123_v59  ;;  %v329_v34 = vld [vmem:[#allocation5 + $0x800] sm:$0xff] }
  0x8d   :  { %4061 = vmatpush1.bf16.xpose.msra.mxu0 %v4060_v35  ;;  %3903 = vmatprep.subr.bf16.mxu1 %v3902_v36  ;;  %v3910_v6 = vpack.c.bf16 %v327_v63, %v246_v62  ;;  %v4528_v35 = vrot.slane %v4522_v23, %v4464_v21  ;;  %v288_v36 = vld [vmem:[#allocation5 + $0x6b8] sm:$0xff]  ;;  %v409_v59 = vld [vmem:[#allocation5 + $0xa80] sm:$0xff]  ;;  %v87_v62 = vld [vmem:[#allocation5 + $0x70] sm:$0xff] }
  0x8e   :  { %4063 = vmatprep.subr.bf16.mxu0 %v4062_v37  ;;  %1295 = vmatprep.mubr.f32.mxu1 %v555_v38  ;;  %v369_v37 = vld [vmem:[#allocation5 + $0x940] sm:$0xff]  ;;  %v734_v38 = vrot.slane %v4524_v26, %v4464_v21  ;;  %v168_v63 = vld [vmem:[#allocation5 + $0x2f8] sm:$0xff]  ;;  %v130_v26 = vld [vmem:[#allocation5 + $0x1c8] sm:$0xff] }
  0x8f   :  { %2695 = vmatprep.mubr.f32.mxu0 %v725_v39  ;;  %v3916_v39 = vpack.c.bf16 %v166_v29, %v85_v28  ;;  %v4078_v42 = vpack.c.bf16 %v369_v37, %v288_v36  ;;  %v572_v43 = vcombine.high %v4528_v35, %v4528_v35  ;;  %v4546_v28 = vld [vmem:[#allocation2 + $0x20] sm:$0xff]  ;;  %v411_v29 = vld [vmem:[#allocation5 + $0xa90] sm:$0xff]  ;;  %v210_v37 = vld [vmem:[#allocation5 + $0x448] sm:$0xff] }
  0x94   :  { %3905 = vmatpush1.bf16.xpose.msra.mxu1 %v3904_v44  ;;  %v742_v44 = vcombine.high %v734_v38, %v734_v38 }
  0x95   :  { %4065 = vmatpush1.bf16.xpose.msra.mxu0 %v4064_v45  ;;  %1239 = vmatprep.subr.mxu1 %v406_v46  ;;  %v247_v45 = vld [vmem:[#allocation5 + $0x570] sm:$0xff]  ;;  %v328_v46 = vld [vmem:[#allocation5 + $0x7f8] sm:$0xff] }
  0x96   :  { %2639 = vmatprep.subr.mxu0 %v446_v47  ;;  %v287_v47 = vld [vmem:[#allocation5 + $0x6b0] sm:$0xff]  ;;  %v3920_v49 = vpack.c.bf16 %v328_v46, %v247_v45 }
  0x97   :  { %v4080_v50 = vpack.c.bf16 %v368_v48, %v287_v47 }
  0x9c   :  { %1240 = vmatpush1.xpose.msra.mxu1 %v405_v54  ;;  %v169_v54 = vld [vmem:[#allocation5 + $0x300] sm:$0xff] }
  0x9d   :  { %2640 = vmatpush1.xpose.msra.mxu0 %v445_v55  ;;  %3907 = vmatprep.subr.bf16.mxu1 %v3906_v56  ;;  %v557_v55 = vcombine.high %v4522_v23, %v4522_v23  ;;  %v128_v56 = vld [vmem:[#allocation5 + $0x1b8] sm:$0xff]  ;;  %v3922_v61 = vpack.c.bf16 %v169_v54, %v88_v53 }
  0x9e   :  { %4067 = vmatprep.subr.bf16.mxu0 %v4066_v60  ;;  %v449_v60 = vld [vmem:[#allocation5 + $0xbc0] sm:$0xff]  ;;  %v4082_v1 = vpack.c.bf16 %v209_v57, %v128_v56  ;;  %v452_v23 = vld [vmem:[#allocation5 + $0xbd8] sm:$0xff]  ;;  %v414_v56 = vld [vmem:[#allocation5 + $0xaa8] sm:$0xff] }
  0x9f   :  { %1296 = vmatmul.mubr.f32.vlgmr.msra.gmra.mrb[0].mxu1 %v4504_v30  ;;  %v125_v30 = vld [vmem:[#allocation5 + $0x1a0] sm:$0xff]  ;;  %v372_v53 = vld [vmem:[#allocation5 + $0x958] sm:$0xff]  ;;  %v454_v57 = vld [vmem:[#allocation5 + $0xbe8] sm:$0xff] }
  0xa0   :  { %3909 = vmatpush1.bf16.xpose.msra.mxu1 %v3908_v4  ;;  %2696 = vmatmul.mubr.f32.vlgmr.msra.gmra.mrb[0].mxu0 %v717_v33  ;;  %v248_v33 = vld [vmem:[#allocation5 + $0x578] sm:$0xff]  ;;  %v4076_v40 = vpack.c.bf16 %v206_v32, %v125_v30  ;;  %v331_v4 = vld [vmem:[#allocation5 + $0x810] sm:$0xff] }
  0xa1   :  { %4069 = vmatpush1.bf16.xpose.msra.mxu0 %v4068_v5  ;;  %3911 = vmatprep.subr.bf16.mxu1 %v3910_v6  ;;  %v3918_v41 = vpack.c.bf16 %v329_v34, %v248_v33  ;;  %v4540_v5 = vrot.slane %v557_v55, %v4464_v21  ;;  %v290_v6 = vld [vmem:[#allocation5 + $0x6c8] sm:$0xff]  ;;  %v451_v30 = vld [vmem:[#allocation5 + $0xbd0] sm:$0xff]  ;;  %v89_v33 = vld [vmem:[#allocation5 + $0x80] sm:$0xff] }
  0xa2   :  { %4071 = vmatprep.subr.bf16.mxu0 %v4070_v7  ;;  %1365 = vmatprep.mubr.f32.mxu1 %v556_v8  ;;  %v371_v7 = vld [vmem:[#allocation5 + $0x950] sm:$0xff]  ;;  %v741_v8 = vrot.slane %v727_v58, %v4464_v21  ;;  %v170_v34 = vld [vmem:[#allocation5 + $0x308] sm:$0xff]  ;;  %v92_v58 = vld [vmem:[#allocation5 + $0x98] sm:$0xff] }
  0xa3   :  { %2765 = vmatprep.mubr.f32.mxu0 %v726_v9  ;;  %v3924_v9 = vpack.c.bf16 %v168_v63, %v87_v62  ;;  %v4086_v12 = vpack.c.bf16 %v371_v7, %v290_v6  ;;  %v573_v13 = vcombine.high %v4540_v5, %v4540_v5  ;;  %v213_v62 = vld [vmem:[#allocation5 + $0x460] sm:$0xff]  ;;  %v212_v7 = vld [vmem:[#allocation5 + $0x458] sm:$0xff] }
  0xa8   :  { %3913 = vmatpush1.bf16.xpose.msra.mxu1 %v3912_v14  ;;  %v743_v14 = vcombine.high %v741_v8, %v741_v8 }
  0xa9   :  { %4073 = vmatpush1.bf16.xpose.msra.mxu0 %v4072_v15  ;;  %1309 = vmatprep.subr.mxu1 %v408_v16  ;;  %v249_v15 = vld [vmem:[#allocation5 + $0x580] sm:$0xff]  ;;  %v330_v16 = vld [vmem:[#allocation5 + $0x808] sm:$0xff] }
  0xaa   :  { %2709 = vmatprep.subr.mxu0 %v448_v17  ;;  %v289_v17 = vld [vmem:[#allocation5 + $0x6c0] sm:$0xff]  ;;  %v3928_v19 = vpack.c.bf16 %v330_v16, %v249_v15 }
  0xab   :  { %v4088_v20 = vpack.c.bf16 %v370_v18, %v289_v17 }
  0xb0   :  { %1310 = vmatpush1.xpose.msra.mxu1 %v407_v24  ;;  %v90_v24 = vld [vmem:[#allocation5 + $0x88] sm:$0xff] }
  0xb1   :  { %2710 = vmatpush1.xpose.msra.mxu0 %v447_v25  ;;  %3915 = vmatprep.subr.bf16.mxu1 %v3914_v27  ;;  %v171_v25 = vld [vmem:[#allocation5 + $0x310] sm:$0xff] }
  0xb2   :  { %4075 = vmatprep.subr.bf16.mxu0 %v4074_v31  ;;  %v211_v27 = vld [vmem:[#allocation5 + $0x450] sm:$0xff]  ;;  %v3930_v32 = vpack.c.bf16 %v171_v25, %v90_v24  ;;  %v374_v24 = vld [vmem:[#allocation5 + $0x968] sm:$0xff] }
  0xb3   :  { %1366 = vmatmul.mubr.f32.vlgmr.msra.gmra.mrb[0].mxu1 %v4516_v0  ;;  %v127_v0 = vld [vmem:[#allocation5 + $0x1b0] sm:$0xff]  ;;  %v4090_v36 = vpack.c.bf16 %v211_v27, %v130_v26  ;;  %v416_v27 = vld [vmem:[#allocation5 + $0xab8] sm:$0xff] }
  0xb4   :  { %3917 = vmatpush1.bf16.xpose.msra.mxu1 %v3916_v39  ;;  %2766 = vmatmul.mubr.f32.vlgmr.msra.gmra.mrb[0].mxu0 %v724_v3  ;;  %v250_v3 = vld [vmem:[#allocation5 + $0x588] sm:$0xff]  ;;  %v4084_v10 = vpack.c.bf16 %v208_v2, %v127_v0  ;;  %v333_v39 = vld [vmem:[#allocation5 + $0x820] sm:$0xff] }
  0xb5   :  { %4077 = vmatpush1.bf16.xpose.msra.mxu0 %v4076_v40  ;;  %3919 = vmatprep.subr.bf16.mxu1 %v3918_v41  ;;  %v3926_v11 = vpack.c.bf16 %v331_v4, %v250_v3  ;;  %v4548_v31 = vld [vmem:[#allocation2 + $0x70] sm:$0xff]  ;;  %v4552_v40 = vrot.slane %v4546_v28, %v4464_v21  ;;  %v292_v41 = vld [vmem:[#allocation5 + $0x6d8] sm:$0xff]  ;;  %v413_v0 = vld [vmem:[#allocation5 + $0xaa0] sm:$0xff] }
  0xb6   :  { %4079 = vmatprep.subr.bf16.mxu0 %v4078_v42  ;;  %1435 = vmatprep.mubr.f32.mxu1 %v572_v43  ;;  %v373_v42 = vld [vmem:[#allocation5 + $0x960] sm:$0xff]  ;;  %v751_v43 = vrot.slane %v4548_v31, %v4464_v21  ;;  %v744_v63 = vcombine.high %v4548_v31, %v4548_v31  ;;  %v91_v3 = vld [vmem:[#allocation5 + $0x90] sm:$0xff]  ;;  %v172_v4 = vld [vmem:[#allocation5 + $0x318] sm:$0xff] }
  0xb7   :  { %2835 = vmatprep.mubr.f32.mxu0 %v742_v44  ;;  %v3932_v44 = vpack.c.bf16 %v170_v34, %v89_v33  ;;  %v4094_v47 = vpack.c.bf16 %v373_v42, %v292_v41  ;;  %v589_v48 = vcombine.high %v4552_v40, %v4552_v40  ;;  %v134_v31 = vld [vmem:[#allocation5 + $0x1e8] sm:$0xff]  ;;  %v415_v34 = vld [vmem:[#allocation5 + $0xab0] sm:$0xff] }
  0xb8   :  { %v4570_v33 = vld [vmem:[#allocation2 + $0x28] sm:$0xff] }
  0xb9   :  { %v214_v42 = vld [vmem:[#allocation5 + $0x468] sm:$0xff] }
  0xbc   :  { %3921 = vmatpush1.bf16.xpose.msra.mxu1 %v3920_v49  ;;  %v759_v49 = vcombine.high %v751_v43, %v751_v43 }
  0xbd   :  { %4081 = vmatpush1.bf16.xpose.msra.mxu0 %v4080_v50  ;;  %1379 = vmatprep.subr.mxu1 %v410_v51  ;;  %v251_v50 = vld [vmem:[#allocation5 + $0x590] sm:$0xff]  ;;  %v332_v51 = vld [vmem:[#allocation5 + $0x818] sm:$0xff] }
  0xbe   :  { %2779 = vmatprep.subr.mxu0 %v450_v52  ;;  %v291_v52 = vld [vmem:[#allocation5 + $0x6d0] sm:$0xff]  ;;  %v3936_v54 = vpack.c.bf16 %v332_v51, %v251_v50 }
  0xbf   :  { %v4096_v55 = vpack.c.bf16 %v372_v53, %v291_v52 }
  0xc4   :  { %1380 = vmatpush1.xpose.msra.mxu1 %v409_v59  ;;  %v173_v59 = vld [vmem:[#allocation5 + $0x320] sm:$0xff] }
  0xc5   :  { %2780 = vmatpush1.xpose.msra.mxu0 %v449_v60  ;;  %3923 = vmatprep.subr.bf16.mxu1 %v3922_v61  ;;  %v574_v60 = vcombine.high %v4546_v28, %v4546_v28  ;;  %v132_v61 = vld [vmem:[#allocation5 + $0x1d8] sm:$0xff]  ;;  %v3938_v2 = vpack.c.bf16 %v173_v59, %v92_v58 }
  0xc6   :  { %4083 = vmatprep.subr.bf16.mxu0 %v4082_v1  ;;  %v453_v1 = vld [vmem:[#allocation5 + $0xbe0] sm:$0xff]  ;;  %v4098_v6 = vpack.c.bf16 %v213_v62, %v132_v61  ;;  %v456_v28 = vld [vmem:[#allocation5 + $0xbf8] sm:$0xff]  ;;  %v418_v61 = vld [vmem:[#allocation5 + $0xac8] sm:$0xff] }
  0xc7   :  { %1436 = vmatmul.mubr.f32.vlgmr.msra.gmra.mrb[0].mxu1 %v4528_v35  ;;  %v129_v35 = vld [vmem:[#allocation5 + $0x1c0] sm:$0xff]  ;;  %v376_v58 = vld [vmem:[#allocation5 + $0x978] sm:$0xff]  ;;  %v458_v62 = vld [vmem:[#allocation5 + $0xc08] sm:$0xff] }
  0xc8   :  { %3925 = vmatpush1.bf16.xpose.msra.mxu1 %v3924_v9  ;;  %2836 = vmatmul.mubr.f32.vlgmr.msra.gmra.mrb[0].mxu0 %v734_v38  ;;  %v252_v38 = vld [vmem:[#allocation5 + $0x598] sm:$0xff]  ;;  %v4092_v45 = vpack.c.bf16 %v210_v37, %v129_v35  ;;  %v335_v9 = vld [vmem:[#allocation5 + $0x830] sm:$0xff] }
  0xc9   :  { %4085 = vmatpush1.bf16.xpose.msra.mxu0 %v4084_v10  ;;  %3927 = vmatprep.subr.bf16.mxu1 %v3926_v11  ;;  %v3934_v46 = vpack.c.bf16 %v333_v39, %v252_v38  ;;  %v4564_v10 = vrot.slane %v574_v60, %v4464_v21  ;;  %v294_v11 = vld [vmem:[#allocation5 + $0x6e8] sm:$0xff]  ;;  %v455_v35 = vld [vmem:[#allocation5 + $0xbf0] sm:$0xff]  ;;  %v93_v38 = vld [vmem:[#allocation5 + $0xa0] sm:$0xff] }
  0xca   :  { %4087 = vmatprep.subr.bf16.mxu0 %v4086_v12  ;;  %1505 = vmatprep.mubr.f32.mxu1 %v573_v13  ;;  %v375_v12 = vld [vmem:[#allocation5 + $0x970] sm:$0xff]  ;;  %v758_v13 = vrot.slane %v744_v63, %v4464_v21  ;;  %v174_v39 = vld [vmem:[#allocation5 + $0x328] sm:$0xff]  ;;  %v96_v63 = vld [vmem:[#allocation5 + $0xb8] sm:$0xff] }
  0xcb   :  { %2905 = vmatprep.mubr.f32.mxu0 %v743_v14  ;;  %v3940_v14 = vpack.c.bf16 %v172_v4, %v91_v3  ;;  %v4102_v17 = vpack.c.bf16 %v375_v12, %v294_v11  ;;  %v590_v18 = vcombine.high %v4564_v10, %v4564_v10  ;;  %v217_v3 = vld [vmem:[#allocation5 + $0x480] sm:$0xff]  ;;  %v216_v12 = vld [vmem:[#allocation5 + $0x478] sm:$0xff] }
  0xd0   :  { %3929 = vmatpush1.bf16.xpose.msra.mxu1 %v3928_v19  ;;  %v760_v19 = vcombine.high %v758_v13, %v758_v13 }
  0xd1   :  { %4089 = vmatpush1.bf16.xpose.msra.mxu0 %v4088_v20  ;;  %1449 = vmatprep.subr.mxu1 %v412_v22  ;;  %v253_v20 = vld [vmem:[#allocation5 + $0x5a0] sm:$0xff]  ;;  %v334_v22 = vld [vmem:[#allocation5 + $0x828] sm:$0xff] }
  0xd2   :  { %2849 = vmatprep.subr.mxu0 %v452_v23  ;;  %v293_v23 = vld [vmem:[#allocation5 + $0x6e0] sm:$0xff]  ;;  %v3944_v25 = vpack.c.bf16 %v334_v22, %v253_v20 }
  0xd3   :  { %v4104_v26 = vpack.c.bf16 %v374_v24, %v293_v23 }
  0xd8   :  { %1450 = vmatpush1.xpose.msra.mxu1 %v411_v29  ;;  %v94_v29 = vld [vmem:[#allocation5 + $0xa8] sm:$0xff] }
  0xd9   :  { %2850 = vmatpush1.xpose.msra.mxu0 %v451_v30  ;;  %3931 = vmatprep.subr.bf16.mxu1 %v3930_v32  ;;  %v175_v30 = vld [vmem:[#allocation5 + $0x330] sm:$0xff] }
  0xda   :  { %4091 = vmatprep.subr.bf16.mxu0 %v4090_v36  ;;  %v215_v32 = vld [vmem:[#allocation5 + $0x470] sm:$0xff]  ;;  %v3946_v37 = vpack.c.bf16 %v175_v30, %v94_v29  ;;  %v378_v29 = vld [vmem:[#allocation5 + $0x988] sm:$0xff] }
  0xdb   :  { %1506 = vmatmul.mubr.f32.vlgmr.msra.gmra.mrb[0].mxu1 %v4540_v5  ;;  %v131_v5 = vld [vmem:[#allocation5 + $0x1d0] sm:$0xff]  ;;  %v4106_v41 = vpack.c.bf16 %v215_v32, %v134_v31  ;;  %v420_v32 = vld [vmem:[#allocation5 + $0xad8] sm:$0xff] }
  0xdc   :  { %3933 = vmatpush1.bf16.xpose.msra.mxu1 %v3932_v44  ;;  %2906 = vmatmul.mubr.f32.vlgmr.msra.gmra.mrb[0].mxu0 %v741_v8  ;;  %v254_v8 = vld [vmem:[#allocation5 + $0x5a8] sm:$0xff]  ;;  %v4100_v15 = vpack.c.bf16 %v212_v7, %v131_v5  ;;  %v4572_v36 = vld [vmem:[#allocation2 + $0x78] sm:$0xff]  ;;  %v337_v44 = vld [vmem:[#allocation5 + $0x840] sm:$0xff] }
  0xdd   :  { %4093 = vmatpush1.bf16.xpose.msra.mxu0 %v4092_v45  ;;  %3935 = vmatprep.subr.bf16.mxu1 %v3934_v46  ;;  %v3942_v16 = vpack.c.bf16 %v335_v9, %v254_v8  ;;  %v4576_v45 = vrot.slane %v4570_v33, %v4464_v21  ;;  %v296_v46 = vld [vmem:[#allocation5 + $0x6f8] sm:$0xff]  ;;  %v761_v4 = vcombine.high %v4572_v36, %v4572_v36  ;;  %v417_v5 = vld [vmem:[#allocation5 + $0xac0] sm:$0xff]  ;;  %v95_v8 = vld [vmem:[#allocation5 + $0xb0] sm:$0xff] }
  0xde   :  { %4095 = vmatprep.subr.bf16.mxu0 %v4094_v47  ;;  %1575 = vmatprep.mubr.f32.mxu1 %v589_v48  ;;  %v377_v47 = vld [vmem:[#allocation5 + $0x980] sm:$0xff]  ;;  %v768_v48 = vrot.slane %v4572_v36, %v4464_v21  ;;  %v176_v9 = vld [vmem:[#allocation5 + $0x338] sm:$0xff]  ;;  %v138_v36 = vld [vmem:[#allocation5 + $0x208] sm:$0xff] }
  0xdf   :  { %2975 = vmatprep.mubr.f32.mxu0 %v759_v49  ;;  %v3948_v49 = vpack.c.bf16 %v174_v39, %v93_v38  ;;  %v4110_v52 = vpack.c.bf16 %v377_v47, %v296_v46  ;;  %v606_v53 = vcombine.high %v4576_v45, %v4576_v45  ;;  %v4594_v38 = vld [vmem:[#allocation2 + $0x30] sm:$0xff] }
  0xe0   :  { %v419_v39 = vld [vmem:[#allocation5 + $0xad0] sm:$0xff]  ;;  %v218_v47 = vld [vmem:[#allocation5 + $0x488] sm:$0xff] }
  0xe4   :  { %3937 = vmatpush1.bf16.xpose.msra.mxu1 %v3936_v54  ;;  %v776_v54 = vcombine.high %v768_v48, %v768_v48 }
  0xe5   :  { %4097 = vmatpush1.bf16.xpose.msra.mxu0 %v4096_v55  ;;  %1519 = vmatprep.subr.mxu1 %v414_v56  ;;  %v255_v55 = vld [vmem:[#allocation5 + $0x5b0] sm:$0xff]  ;;  %v336_v56 = vld [vmem:[#allocation5 + $0x838] sm:$0xff] }
  0xe6   :  { %2919 = vmatprep.subr.mxu0 %v454_v57  ;;  %v295_v57 = vld [vmem:[#allocation5 + $0x6f0] sm:$0xff]  ;;  %v3952_v59 = vpack.c.bf16 %v336_v56, %v255_v55 }
  0xe7   :  { %v4112_v60 = vpack.c.bf16 %v376_v58, %v295_v57 }
  0xec   :  { %1520 = vmatpush1.xpose.msra.mxu1 %v413_v0  ;;  %v177_v0 = vld [vmem:[#allocation5 + $0x340] sm:$0xff] }
  0xed   :  { %2920 = vmatpush1.xpose.msra.mxu0 %v453_v1  ;;  %3939 = vmatprep.subr.bf16.mxu1 %v3938_v2  ;;  %v591_v1 = vcombine.high %v4570_v33, %v4570_v33  ;;  %v136_v2 = vld [vmem:[#allocation5 + $0x1f8] sm:$0xff]  ;;  %v3954_v7 = vpack.c.bf16 %v177_v0, %v96_v63 }
  0xee   :  { %4099 = vmatprep.subr.bf16.mxu0 %v4098_v6  ;;  %v457_v6 = vld [vmem:[#allocation5 + $0xc00] sm:$0xff]  ;;  %v4114_v11 = vpack.c.bf16 %v217_v3, %v136_v2  ;;  %v460_v33 = vld [vmem:[#allocation5 + $0xc18] sm:$0xff]  ;;  %v422_v2 = vld [vmem:[#allocation5 + $0xae8] sm:$0xff] }
  0xef   :  { %1576 = vmatmul.mubr.f32.vlgmr.msra.gmra.mrb[0].mxu1 %v4552_v40  ;;  %v133_v40 = vld [vmem:[#allocation5 + $0x1e0] sm:$0xff]  ;;  %v380_v63 = vld [vmem:[#allocation5 + $0x998] sm:$0xff]  ;;  %v462_v3 = vld [vmem:[#allocation5 + $0xc28] sm:$0xff] }
  0xf0   :  { %3941 = vmatpush1.bf16.xpose.msra.mxu1 %v3940_v14  ;;  %2976 = vmatmul.mubr.f32.vlgmr.msra.gmra.mrb[0].mxu0 %v751_v43  ;;  %v256_v43 = vld [vmem:[#allocation5 + $0x5b8] sm:$0xff]  ;;  %v4108_v50 = vpack.c.bf16 %v214_v42, %v133_v40  ;;  %v339_v14 = vld [vmem:[#allocation5 + $0x850] sm:$0xff] }
  0xf1   :  { %4101 = vmatpush1.bf16.xpose.msra.mxu0 %v4100_v15  ;;  %3943 = vmatprep.subr.bf16.mxu1 %v3942_v16  ;;  %v3950_v51 = vpack.c.bf16 %v337_v44, %v256_v43  ;;  %v4588_v15 = vrot.slane %v591_v1, %v4464_v21  ;;  %v298_v16 = vld [vmem:[#allocation5 + $0x708] sm:$0xff]  ;;  %v459_v40 = vld [vmem:[#allocation5 + $0xc10] sm:$0xff]  ;;  %v97_v43 = vld [vmem:[#allocation5 + $0xc0] sm:$0xff] }
  0xf2   :  { %4103 = vmatprep.subr.bf16.mxu0 %v4102_v17  ;;  %1645 = vmatprep.mubr.f32.mxu1 %v590_v18  ;;  %v379_v17 = vld [vmem:[#allocation5 + $0x990] sm:$0xff]  ;;  %v775_v18 = vrot.slane %v761_v4, %v4464_v21  ;;  %v178_v44 = vld [vmem:[#allocation5 + $0x348] sm:$0xff]  ;;  %v100_v4 = vld [vmem:[#allocation5 + $0xd8] sm:$0xff] }
  0xf3   :  { %3045 = vmatprep.mubr.f32.mxu0 %v760_v19  ;;  %v3956_v19 = vpack.c.bf16 %v176_v9, %v95_v8  ;;  %v4118_v23 = vpack.c.bf16 %v379_v17, %v298_v16  ;;  %v607_v24 = vcombine.high %v4588_v15, %v4588_v15  ;;  %v221_v8 = vld [vmem:[#allocation5 + $0x4a0] sm:$0xff]  ;;  %v220_v17 = vld [vmem:[#allocation5 + $0x498] sm:$0xff] }
  0xf8   :  { %3945 = vmatpush1.bf16.xpose.msra.mxu1 %v3944_v25  ;;  %v777_v25 = vcombine.high %v775_v18, %v775_v18 }
  0xf9   :  { %4105 = vmatpush1.bf16.xpose.msra.mxu0 %v4104_v26  ;;  %1589 = vmatprep.subr.mxu1 %v416_v27  ;;  %v257_v26 = vld [vmem:[#allocation5 + $0x5c0] sm:$0xff]  ;;  %v338_v27 = vld [vmem:[#allocation5 + $0x848] sm:$0xff] }
  0xfa   :  { %2989 = vmatprep.subr.mxu0 %v456_v28  ;;  %v297_v28 = vld [vmem:[#allocation5 + $0x700] sm:$0xff]  ;;  %v3960_v30 = vpack.c.bf16 %v338_v27, %v257_v26 }
  0xfb   :  { %v4120_v31 = vpack.c.bf16 %v378_v29, %v297_v28 }
 0x100   :  { %1590 = vmatpush1.xpose.msra.mxu1 %v415_v34  ;;  %v98_v34 = vld [vmem:[#allocation5 + $0xc8] sm:$0xff] }
 0x101   :  { %2990 = vmatpush1.xpose.msra.mxu0 %v455_v35  ;;  %3947 = vmatprep.subr.bf16.mxu1 %v3946_v37  ;;  %v179_v35 = vld [vmem:[#allocation5 + $0x350] sm:$0xff] }
 0x102   :  { %4107 = vmatprep.subr.bf16.mxu0 %v4106_v41  ;;  %v219_v37 = vld [vmem:[#allocation5 + $0x490] sm:$0xff]  ;;  %v4596_v41 = vld [vmem:[#allocation2 + $0x80] sm:$0xff]  ;;  %v3962_v42 = vpack.c.bf16 %v179_v35, %v98_v34  ;;  %v382_v34 = vld [vmem:[#allocation5 + $0x9a8] sm:$0xff] }
 0x103   :  { %1646 = vmatmul.mubr.f32.vlgmr.msra.gmra.mrb[0].mxu1 %v4564_v10  ;;  %v135_v10 = vld [vmem:[#allocation5 + $0x1f0] sm:$0xff]  ;;  %v4122_v46 = vpack.c.bf16 %v219_v37, %v138_v36  ;;  %v778_v9 = vcombine.high %v4596_v41, %v4596_v41  ;;  %v424_v37 = vld [vmem:[#allocation5 + $0xaf8] sm:$0xff] }
 0x104   :  { %3949 = vmatpush1.bf16.xpose.msra.mxu1 %v3948_v49  ;;  %3046 = vmatmul.mubr.f32.vlgmr.msra.gmra.mrb[0].mxu0 %v758_v13  ;;  %v258_v13 = vld [vmem:[#allocation5 + $0x5c8] sm:$0xff]  ;;  %v4116_v20 = vpack.c.bf16 %v216_v12, %v135_v10  ;;  %v341_v49 = vld [vmem:[#allocation5 + $0x860] sm:$0xff] }
 0x105   :  { %4109 = vmatpush1.bf16.xpose.msra.mxu0 %v4108_v50  ;;  %3951 = vmatprep.subr.bf16.mxu1 %v3950_v51  ;;  %v3958_v22 = vpack.c.bf16 %v339_v14, %v258_v13  ;;  %v4600_v50 = vrot.slane %v4594_v38, %v4464_v21  ;;  %v300_v51 = vld [vmem:[#allocation5 + $0x718] sm:$0xff]  ;;  %v421_v10 = vld [vmem:[#allocation5 + $0xae0] sm:$0xff]  ;;  %v99_v13 = vld [vmem:[#allocation5 + $0xd0] sm:$0xff] }
 0x106   :  { %4111 = vmatprep.subr.bf16.mxu0 %v4110_v52  ;;  %1715 = vmatprep.mubr.f32.mxu1 %v606_v53  ;;  %v381_v52 = vld [vmem:[#allocation5 + $0x9a0] sm:$0xff]  ;;  %v785_v53 = vrot.slane %v4596_v41, %v4464_v21  ;;  %v180_v14 = vld [vmem:[#allocation5 + $0x358] sm:$0xff]  ;;  %v142_v41 = vld [vmem:[#allocation5 + $0x228] sm:$0xff] }
 0x107   :  { %3115 = vmatprep.mubr.f32.mxu0 %v776_v54  ;;  %v3964_v54 = vpack.c.bf16 %v178_v44, %v97_v43  ;;  %v4126_v57 = vpack.c.bf16 %v381_v52, %v300_v51  ;;  %v623_v58 = vcombine.high %v4600_v50, %v4600_v50  ;;  %v4618_v43 = vld [vmem:[#allocation2 + $0x38] sm:$0xff]  ;;  %v222_v52 = vld [vmem:[#allocation5 + $0x4a8] sm:$0xff] }
 0x108   :  { %v423_v44 = vld [vmem:[#allocation5 + $0xaf0] sm:$0xff] }
 0x10c   :  { %3953 = vmatpush1.bf16.xpose.msra.mxu1 %v3952_v59  ;;  %v793_v59 = vcombine.high %v785_v53, %v785_v53 }
 0x10d   :  { %4113 = vmatpush1.bf16.xpose.msra.mxu0 %v4112_v60  ;;  %1659 = vmatprep.subr.mxu1 %v418_v61  ;;  %v259_v60 = vld [vmem:[#allocation5 + $0x5d0] sm:$0xff]  ;;  %v340_v61 = vld [vmem:[#allocation5 + $0x858] sm:$0xff] }
 0x10e   :  { %3059 = vmatprep.subr.mxu0 %v458_v62  ;;  %v299_v62 = vld [vmem:[#allocation5 + $0x710] sm:$0xff]  ;;  %v3968_v0 = vpack.c.bf16 %v340_v61, %v259_v60 }
 0x10f   :  { %v4128_v1 = vpack.c.bf16 %v380_v63, %v299_v62 }
 0x114   :  { %1660 = vmatpush1.xpose.msra.mxu1 %v417_v5  ;;  %v181_v5 = vld [vmem:[#allocation5 + $0x360] sm:$0xff] }
 0x115   :  { %3060 = vmatpush1.xpose.msra.mxu0 %v457_v6  ;;  %3955 = vmatprep.subr.bf16.mxu1 %v3954_v7  ;;  %v608_v6 = vcombine.high %v4594_v38, %v4594_v38  ;;  %v140_v7 = vld [vmem:[#allocation5 + $0x218] sm:$0xff]  ;;  %v3970_v12 = vpack.c.bf16 %v181_v5, %v100_v4 }
 0x116   :  { %4115 = vmatprep.subr.bf16.mxu0 %v4114_v11  ;;  %v461_v11 = vld [vmem:[#allocation5 + $0xc20] sm:$0xff]  ;;  %v4130_v16 = vpack.c.bf16 %v221_v8, %v140_v7  ;;  %v464_v38 = vld [vmem:[#allocation5 + $0xc38] sm:$0xff]  ;;  %v426_v7 = vld [vmem:[#allocation5 + $0xb08] sm:$0xff] }
 0x117   :  { %1716 = vmatmul.mubr.f32.vlgmr.msra.gmra.mrb[0].mxu1 %v4576_v45  ;;  %v137_v45 = vld [vmem:[#allocation5 + $0x200] sm:$0xff]  ;;  %v384_v4 = vld [vmem:[#allocation5 + $0x9b8] sm:$0xff]  ;;  %v466_v8 = vld [vmem:[#allocation5 + $0xc48] sm:$0xff] }
 0x118   :  { %3957 = vmatpush1.bf16.xpose.msra.mxu1 %v3956_v19  ;;  %3116 = vmatmul.mubr.f32.vlgmr.msra.gmra.mrb[0].mxu0 %v768_v48  ;;  %v260_v48 = vld [vmem:[#allocation5 + $0x5d8] sm:$0xff]  ;;  %v4124_v55 = vpack.c.bf16 %v218_v47, %v137_v45  ;;  %v343_v19 = vld [vmem:[#allocation5 + $0x870] sm:$0xff] }
 0x119   :  { %4117 = vmatpush1.bf16.xpose.msra.mxu0 %v4116_v20  ;;  %3959 = vmatprep.subr.bf16.mxu1 %v3958_v22  ;;  %v3966_v56 = vpack.c.bf16 %v341_v49, %v260_v48  ;;  %v4612_v20 = vrot.slane %v608_v6, %v4464_v21  ;;  %v302_v22 = vld [vmem:[#allocation5 + $0x728] sm:$0xff]  ;;  %v463_v45 = vld [vmem:[#allocation5 + $0xc30] sm:$0xff]  ;;  %v101_v48 = vld [vmem:[#allocation5 + $0xe0] sm:$0xff] }
 0x11a   :  { %4119 = vmatprep.subr.bf16.mxu0 %v4118_v23  ;;  %1785 = vmatprep.mubr.f32.mxu1 %v607_v24  ;;  %v383_v23 = vld [vmem:[#allocation5 + $0x9b0] sm:$0xff]  ;;  %v792_v24 = vrot.slane %v778_v9, %v4464_v21  ;;  %v182_v49 = vld [vmem:[#allocation5 + $0x368] sm:$0xff]  ;;  %v104_v9 = vld [vmem:[#allocation5 + $0xf8] sm:$0xff] }
 0x11b   :  { %3185 = vmatprep.mubr.f32.mxu0 %v777_v25  ;;  %v3972_v25 = vpack.c.bf16 %v180_v14, %v99_v13  ;;  %v4134_v28 = vpack.c.bf16 %v383_v23, %v302_v22  ;;  %v624_v29 = vcombine.high %v4612_v20, %v4612_v20  ;;  %v225_v13 = vld [vmem:[#allocation5 + $0x4c0] sm:$0xff]  ;;  %v224_v23 = vld [vmem:[#allocation5 + $0x4b8] sm:$0xff] }
 0x120   :  { %3961 = vmatpush1.bf16.xpose.msra.mxu1 %v3960_v30  ;;  %v794_v30 = vcombine.high %v792_v24, %v792_v24 }
 0x121   :  { %4121 = vmatpush1.bf16.xpose.msra.mxu0 %v4120_v31  ;;  %1729 = vmatprep.subr.mxu1 %v420_v32  ;;  %v261_v31 = vld [vmem:[#allocation5 + $0x5e0] sm:$0xff]  ;;  %v342_v32 = vld [vmem:[#allocation5 + $0x868] sm:$0xff] }
 0x122   :  { %3129 = vmatprep.subr.mxu0 %v460_v33  ;;  %v301_v33 = vld [vmem:[#allocation5 + $0x720] sm:$0xff]  ;;  %v3976_v35 = vpack.c.bf16 %v342_v32, %v261_v31 }
 0x123   :  { %v4136_v36 = vpack.c.bf16 %v382_v34, %v301_v33 }
 0x128   :  { %1730 = vmatpush1.xpose.msra.mxu1 %v419_v39  ;;  %v102_v39 = vld [vmem:[#allocation5 + $0xe8] sm:$0xff] }
 0x129   :  { %3130 = vmatpush1.xpose.msra.mxu0 %v459_v40  ;;  %3963 = vmatprep.subr.bf16.mxu1 %v3962_v42  ;;  %v183_v40 = vld [vmem:[#allocation5 + $0x370] sm:$0xff] }
 0x12a   :  { %4123 = vmatprep.subr.bf16.mxu0 %v4122_v46  ;;  %v223_v42 = vld [vmem:[#allocation5 + $0x4b0] sm:$0xff]  ;;  %v4620_v46 = vld [vmem:[#allocation2 + $0x88] sm:$0xff]  ;;  %v3978_v47 = vpack.c.bf16 %v183_v40, %v102_v39 }
 0x12b   :  { %1786 = vmatmul.mubr.f32.vlgmr.msra.gmra.mrb[0].mxu1 %v4588_v15  ;;  %v139_v15 = vld [vmem:[#allocation5 + $0x210] sm:$0xff]  ;;  %v4138_v51 = vpack.c.bf16 %v223_v42, %v142_v41  ;;  %v795_v14 = vcombine.high %v4620_v46, %v4620_v46  ;;  %v386_v39 = vld [vmem:[#allocation5 + $0x9c8] sm:$0xff]  ;;  %v428_v42 = vld [vmem:[#allocation5 + $0xb18] sm:$0xff] }
 0x12c   :  { %3965 = vmatpush1.bf16.xpose.msra.mxu1 %v3964_v54  ;;  %3186 = vmatmul.mubr.f32.vlgmr.msra.gmra.mrb[0].mxu0 %v775_v18  ;;  %v262_v18 = vld [vmem:[#allocation5 + $0x5e8] sm:$0xff]  ;;  %v4132_v26 = vpack.c.bf16 %v220_v17, %v139_v15  ;;  %v345_v54 = vld [vmem:[#allocation5 + $0x880] sm:$0xff] }
 0x12d   :  { %4125 = vmatpush1.bf16.xpose.msra.mxu0 %v4124_v55  ;;  %3967 = vmatprep.subr.bf16.mxu1 %v3966_v56  ;;  %v3974_v27 = vpack.c.bf16 %v343_v19, %v262_v18  ;;  %v4624_v55 = vrot.slane %v4618_v43, %v4464_v21  ;;  %v304_v56 = vld [vmem:[#allocation5 + $0x738] sm:$0xff]  ;;  %v425_v15 = vld [vmem:[#allocation5 + $0xb00] sm:$0xff]  ;;  %v103_v18 = vld [vmem:[#allocation5 + $0xf0] sm:$0xff] }
 0x12e   :  { %4127 = vmatprep.subr.bf16.mxu0 %v4126_v57  ;;  %1855 = vmatprep.mubr.f32.mxu1 %v623_v58  ;;  %v385_v57 = vld [vmem:[#allocation5 + $0x9c0] sm:$0xff]  ;;  %v802_v58 = vrot.slane %v4620_v46, %v4464_v21  ;;  %v184_v19 = vld [vmem:[#allocation5 + $0x378] sm:$0xff]  ;;  %v146_v46 = vld [vmem:[#allocation5 + $0x248] sm:$0xff] }
 0x12f   :  { %3255 = vmatprep.mubr.f32.mxu0 %v793_v59  ;;  %v3980_v59 = vpack.c.bf16 %v182_v49, %v101_v48  ;;  %v4142_v62 = vpack.c.bf16 %v385_v57, %v304_v56  ;;  %v640_v63 = vcombine.high %v4624_v55, %v4624_v55  ;;  %v4642_v48 = vld [vmem:[#allocation2 + $0x40] sm:$0xff]  ;;  %v427_v49 = vld [vmem:[#allocation5 + $0xb10] sm:$0xff]  ;;  %v226_v57 = vld [vmem:[#allocation5 + $0x4c8] sm:$0xff] }
 0x134   :  { %3969 = vmatpush1.bf16.xpose.msra.mxu1 %v3968_v0  ;;  %v810_v0 = vcombine.high %v802_v58, %v802_v58 }
 0x135   :  { %4129 = vmatpush1.bf16.xpose.msra.mxu0 %v4128_v1  ;;  %1799 = vmatprep.subr.mxu1 %v422_v2  ;;  %v263_v1 = vld [vmem:[#allocation5 + $0x5f0] sm:$0xff]  ;;  %v344_v2 = vld [vmem:[#allocation5 + $0x878] sm:$0xff] }
 0x136   :  { %3199 = vmatprep.subr.mxu0 %v462_v3  ;;  %v303_v3 = vld [vmem:[#allocation5 + $0x730] sm:$0xff]  ;;  %v3984_v5 = vpack.c.bf16 %v344_v2, %v263_v1 }
 0x137   :  { %v4144_v6 = vpack.c.bf16 %v384_v4, %v303_v3 }
 0x13c   :  { %1800 = vmatpush1.xpose.msra.mxu1 %v421_v10  ;;  %v185_v10 = vld [vmem:[#allocation5 + $0x380] sm:$0xff] }
 0x13d   :  { %3200 = vmatpush1.xpose.msra.mxu0 %v461_v11  ;;  %3971 = vmatprep.subr.bf16.mxu1 %v3970_v12  ;;  %v625_v11 = vcombine.high %v4618_v43, %v4618_v43  ;;  %v144_v12 = vld [vmem:[#allocation5 + $0x238] sm:$0xff]  ;;  %v3986_v17 = vpack.c.bf16 %v185_v10, %v104_v9 }
 0x13e   :  { %4131 = vmatprep.subr.bf16.mxu0 %v4130_v16  ;;  %v465_v16 = vld [vmem:[#allocation5 + $0xc40] sm:$0xff]  ;;  %v4146_v22 = vpack.c.bf16 %v225_v13, %v144_v12  ;;  %v468_v43 = vld [vmem:[#allocation5 + $0xc58] sm:$0xff]  ;;  %v430_v12 = vld [vmem:[#allocation5 + $0xb28] sm:$0xff] }
 0x13f   :  { %1856 = vmatmul.mubr.f32.vlgmr.msra.gmra.mrb[0].mxu1 %v4600_v50  ;;  %v141_v50 = vld [vmem:[#allocation5 + $0x220] sm:$0xff]  ;;  %v388_v9 = vld [vmem:[#allocation5 + $0x9d8] sm:$0xff]  ;;  %v470_v13 = vld [vmem:[#allocation5 + $0xc68] sm:$0xff] }
 0x140   :  { %3973 = vmatpush1.bf16.xpose.msra.mxu1 %v3972_v25  ;;  %3256 = vmatmul.mubr.f32.vlgmr.msra.gmra.mrb[0].mxu0 %v785_v53  ;;  %v264_v53 = vld [vmem:[#allocation5 + $0x5f8] sm:$0xff]  ;;  %v4140_v60 = vpack.c.bf16 %v222_v52, %v141_v50  ;;  %v347_v25 = vld [vmem:[#allocation5 + $0x890] sm:$0xff] }
 0x141   :  { %4133 = vmatpush1.bf16.xpose.msra.mxu0 %v4132_v26  ;;  %3975 = vmatprep.subr.bf16.mxu1 %v3974_v27  ;;  %v3982_v61 = vpack.c.bf16 %v345_v54, %v264_v53  ;;  %v4636_v26 = vrot.slane %v625_v11, %v4464_v21  ;;  %v306_v27 = vld [vmem:[#allocation5 + $0x748] sm:$0xff]  ;;  %v467_v50 = vld [vmem:[#allocation5 + $0xc50] sm:$0xff]  ;;  %v105_v53 = vld [vmem:[#allocation5 + $0x100] sm:$0xff] }
 0x142   :  { %4135 = vmatprep.subr.bf16.mxu0 %v4134_v28  ;;  %1925 = vmatprep.mubr.f32.mxu1 %v624_v29  ;;  %v387_v28 = vld [vmem:[#allocation5 + $0x9d0] sm:$0xff]  ;;  %v809_v29 = vrot.slane %v795_v14, %v4464_v21  ;;  %v186_v54 = vld [vmem:[#allocation5 + $0x388] sm:$0xff]  ;;  %v108_v14 = vld [vmem:[#allocation5 + $0x118] sm:$0xff] }
 0x143   :  { %3325 = vmatprep.mubr.f32.mxu0 %v794_v30  ;;  %v3988_v30 = vpack.c.bf16 %v184_v19, %v103_v18  ;;  %v4150_v33 = vpack.c.bf16 %v387_v28, %v306_v27  ;;  %v641_v34 = vcombine.high %v4636_v26, %v4636_v26  ;;  %v229_v18 = vld [vmem:[#allocation5 + $0x4e0] sm:$0xff]  ;;  %v228_v28 = vld [vmem:[#allocation5 + $0x4d8] sm:$0xff] }
 0x148   :  { %3977 = vmatpush1.bf16.xpose.msra.mxu1 %v3976_v35  ;;  %v811_v35 = vcombine.high %v809_v29, %v809_v29 }
 0x149   :  { %4137 = vmatpush1.bf16.xpose.msra.mxu0 %v4136_v36  ;;  %1869 = vmatprep.subr.mxu1 %v424_v37  ;;  %v265_v36 = vld [vmem:[#allocation5 + $0x600] sm:$0xff]  ;;  %v346_v37 = vld [vmem:[#allocation5 + $0x888] sm:$0xff] }
 0x14a   :  { %3269 = vmatprep.subr.mxu0 %v464_v38  ;;  %v305_v38 = vld [vmem:[#allocation5 + $0x740] sm:$0xff]  ;;  %v3992_v40 = vpack.c.bf16 %v346_v37, %v265_v36 }
 0x14b   :  { %v4152_v41 = vpack.c.bf16 %v386_v39, %v305_v38 }
 0x150   :  { %1870 = vmatpush1.xpose.msra.mxu1 %v423_v44  ;;  %v106_v44 = vld [vmem:[#allocation5 + $0x108] sm:$0xff] }
 0x151   :  { %3270 = vmatpush1.xpose.msra.mxu0 %v463_v45  ;;  %3979 = vmatprep.subr.bf16.mxu1 %v3978_v47  ;;  %v187_v45 = vld [vmem:[#allocation5 + $0x390] sm:$0xff] }
 0x152   :  { %4139 = vmatprep.subr.bf16.mxu0 %v4138_v51  ;;  %v227_v47 = vld [vmem:[#allocation5 + $0x4d0] sm:$0xff]  ;;  %v3994_v52 = vpack.c.bf16 %v187_v45, %v106_v44  ;;  %v390_v44 = vld [vmem:[#allocation5 + $0x9e8] sm:$0xff] }
 0x153   :  { %1926 = vmatmul.mubr.f32.vlgmr.msra.gmra.mrb[0].mxu1 %v4612_v20  ;;  %v143_v20 = vld [vmem:[#allocation5 + $0x230] sm:$0xff]  ;;  %v4154_v56 = vpack.c.bf16 %v227_v47, %v146_v46  ;;  %v432_v47 = vld [vmem:[#allocation5 + $0xb38] sm:$0xff] }
 0x154   :  { %3981 = vmatpush1.bf16.xpose.msra.mxu1 %v3980_v59  ;;  %3326 = vmatmul.mubr.f32.vlgmr.msra.gmra.mrb[0].mxu0 %v792_v24  ;;  %v266_v24 = vld [vmem:[#allocation5 + $0x608] sm:$0xff]  ;;  %v4148_v31 = vpack.c.bf16 %v224_v23, %v143_v20  ;;  %v349_v59 = vld [vmem:[#allocation5 + $0x8a0] sm:$0xff] }
 0x155   :  { %4141 = vmatpush1.bf16.xpose.msra.mxu0 %v4140_v60  ;;  %3983 = vmatprep.subr.bf16.mxu1 %v3982_v61  ;;  %v3990_v32 = vpack.c.bf16 %v347_v25, %v266_v24  ;;  %v4644_v51 = vld [vmem:[#allocation2 + $0x90] sm:$0xff]  ;;  %v4648_v60 = vrot.slane %v4642_v48, %v4464_v21  ;;  %v308_v61 = vld [vmem:[#allocation5 + $0x758] sm:$0xff]  ;;  %v429_v20 = vld [vmem:[#allocation5 + $0xb20] sm:$0xff] }
 0x156   :  { %4143 = vmatprep.subr.bf16.mxu0 %v4142_v62  ;;  %1995 = vmatprep.mubr.f32.mxu1 %v640_v63  ;;  %v389_v62 = vld [vmem:[#allocation5 + $0x9e0] sm:$0xff]  ;;  %v819_v63 = vrot.slane %v4644_v51, %v4464_v21  ;;  %v812_v19 = vcombine.high %v4644_v51, %v4644_v51  ;;  %v107_v24 = vld [vmem:[#allocation5 + $0x110] sm:$0xff]  ;;  %v188_v25 = vld [vmem:[#allocation5 + $0x398] sm:$0xff] }
 0x157   :  { %3395 = vmatprep.mubr.f32.mxu0 %v810_v0  ;;  %v3996_v0 = vpack.c.bf16 %v186_v54, %v105_v53  ;;  %v4158_v3 = vpack.c.bf16 %v389_v62, %v308_v61  ;;  %v657_v4 = vcombine.high %v4648_v60, %v4648_v60  ;;  %v150_v51 = vld [vmem:[#allocation5 + $0x268] sm:$0xff]  ;;  %v431_v54 = vld [vmem:[#allocation5 + $0xb30] sm:$0xff] }
 0x158   :  { %v4666_v53 = vld [vmem:[#allocation2 + $0x48] sm:$0xff] }
 0x159   :  { %v230_v62 = vld [vmem:[#allocation5 + $0x4e8] sm:$0xff] }
 0x15c   :  { %3985 = vmatpush1.bf16.xpose.msra.mxu1 %v3984_v5  ;;  %v827_v5 = vcombine.high %v819_v63, %v819_v63 }
 0x15d   :  { %4145 = vmatpush1.bf16.xpose.msra.mxu0 %v4144_v6  ;;  %1939 = vmatprep.subr.mxu1 %v426_v7  ;;  %v267_v6 = vld [vmem:[#allocation5 + $0x610] sm:$0xff]  ;;  %v348_v7 = vld [vmem:[#allocation5 + $0x898] sm:$0xff] }
 0x15e   :  { %3339 = vmatprep.subr.mxu0 %v466_v8  ;;  %v307_v8 = vld [vmem:[#allocation5 + $0x750] sm:$0xff]  ;;  %v4000_v10 = vpack.c.bf16 %v348_v7, %v267_v6 }
 0x15f   :  { %v4160_v11 = vpack.c.bf16 %v388_v9, %v307_v8 }
 0x164   :  { %1940 = vmatpush1.xpose.msra.mxu1 %v425_v15  ;;  %v189_v15 = vld [vmem:[#allocation5 + $0x3a0] sm:$0xff] }
 0x165   :  { %3340 = vmatpush1.xpose.msra.mxu0 %v465_v16  ;;  %3987 = vmatprep.subr.bf16.mxu1 %v3986_v17  ;;  %v642_v16 = vcombine.high %v4642_v48, %v4642_v48  ;;  %v148_v17 = vld [vmem:[#allocation5 + $0x258] sm:$0xff]  ;;  %v4002_v23 = vpack.c.bf16 %v189_v15, %v108_v14 }
 0x166   :  { %4147 = vmatprep.subr.bf16.mxu0 %v4146_v22  ;;  %v469_v22 = vld [vmem:[#allocation5 + $0xc60] sm:$0xff]  ;;  %v4162_v27 = vpack.c.bf16 %v229_v18, %v148_v17  ;;  %v472_v48 = vld [vmem:[#allocation5 + $0xc78] sm:$0xff]  ;;  %v434_v17 = vld [vmem:[#allocation5 + $0xb48] sm:$0xff] }
 0x167   :  { %1996 = vmatmul.mubr.f32.vlgmr.msra.gmra.mrb[0].mxu1 %v4624_v55  ;;  %v145_v55 = vld [vmem:[#allocation5 + $0x240] sm:$0xff]  ;;  %v392_v14 = vld [vmem:[#allocation5 + $0x9f8] sm:$0xff]  ;;  %v474_v18 = vld [vmem:[#allocation5 + $0xc88] sm:$0xff] }
 0x168   :  { %3989 = vmatpush1.bf16.xpose.msra.mxu1 %v3988_v30  ;;  %3396 = vmatmul.mubr.f32.vlgmr.msra.gmra.mrb[0].mxu0 %v802_v58  ;;  %v268_v58 = vld [vmem:[#allocation5 + $0x618] sm:$0xff]  ;;  %v4156_v1 = vpack.c.bf16 %v226_v57, %v145_v55  ;;  %v351_v30 = vld [vmem:[#allocation5 + $0x8b0] sm:$0xff] }
 0x169   :  { %4149 = vmatpush1.bf16.xpose.msra.mxu0 %v4148_v31  ;;  %3991 = vmatprep.subr.bf16.mxu1 %v3990_v32  ;;  %v3998_v2 = vpack.c.bf16 %v349_v59, %v268_v58  ;;  %v4660_v31 = vrot.slane %v642_v16, %v4464_v21  ;;  %v310_v32 = vld [vmem:[#allocation5 + $0x768] sm:$0xff]  ;;  %v471_v55 = vld [vmem:[#allocation5 + $0xc70] sm:$0xff]  ;;  %v109_v58 = vld [vmem:[#allocation5 + $0x120] sm:$0xff] }
 0x16a   :  { %4151 = vmatprep.subr.bf16.mxu0 %v4150_v33  ;;  %2065 = vmatprep.mubr.f32.mxu1 %v641_v34  ;;  %v391_v33 = vld [vmem:[#allocation5 + $0x9f0] sm:$0xff]  ;;  %v826_v34 = vrot.slane %v812_v19, %v4464_v21  ;;  %v190_v59 = vld [vmem:[#allocation5 + $0x3a8] sm:$0xff]  ;;  %v112_v19 = vld [vmem:[#allocation5 + $0x138] sm:$0xff] }
 0x16b   :  { %3465 = vmatprep.mubr.f32.mxu0 %v811_v35  ;;  %v4004_v35 = vpack.c.bf16 %v188_v25, %v107_v24  ;;  %v4166_v38 = vpack.c.bf16 %v391_v33, %v310_v32  ;;  %v658_v39 = vcombine.high %v4660_v31, %v4660_v31  ;;  %v233_v24 = vld [vmem:[#allocation5 + $0x500] sm:$0xff]  ;;  %v232_v33 = vld [vmem:[#allocation5 + $0x4f8] sm:$0xff] }
 0x170   :  { %3993 = vmatpush1.bf16.xpose.msra.mxu1 %v3992_v40  ;;  %v828_v40 = vcombine.high %v826_v34, %v826_v34 }
 0x171   :  { %4153 = vmatpush1.bf16.xpose.msra.mxu0 %v4152_v41  ;;  %2009 = vmatprep.subr.mxu1 %v428_v42  ;;  %v269_v41 = vld [vmem:[#allocation5 + $0x620] sm:$0xff]  ;;  %v350_v42 = vld [vmem:[#allocation5 + $0x8a8] sm:$0xff] }
 0x172   :  { %3409 = vmatprep.subr.mxu0 %v468_v43  ;;  %v309_v43 = vld [vmem:[#allocation5 + $0x760] sm:$0xff]  ;;  %v4008_v45 = vpack.c.bf16 %v350_v42, %v269_v41 }
 0x173   :  { %v4168_v46 = vpack.c.bf16 %v390_v44, %v309_v43 }
 0x178   :  { %2010 = vmatpush1.xpose.msra.mxu1 %v427_v49  ;;  %v110_v49 = vld [vmem:[#allocation5 + $0x128] sm:$0xff] }
 0x179   :  { %3410 = vmatpush1.xpose.msra.mxu0 %v467_v50  ;;  %3995 = vmatprep.subr.bf16.mxu1 %v3994_v52  ;;  %v191_v50 = vld [vmem:[#allocation5 + $0x3b0] sm:$0xff] }
 0x17a   :  { %4155 = vmatprep.subr.bf16.mxu0 %v4154_v56  ;;  %v231_v52 = vld [vmem:[#allocation5 + $0x4f0] sm:$0xff]  ;;  %v4010_v57 = vpack.c.bf16 %v191_v50, %v110_v49 }
 0x17b   :  { %2066 = vmatmul.mubr.f32.vlgmr.msra.gmra.mrb[0].mxu1 %v4636_v26  ;;  %v147_v26 = vld [vmem:[#allocation5 + $0x250] sm:$0xff]  ;;  %v4170_v61 = vpack.c.bf16 %v231_v52, %v150_v51  ;;  %v436_v51 = vld [vmem:[#allocation5 + $0xb58] sm:$0xff] }
 0x17c   :  { %3997 = vmatpush1.bf16.xpose.msra.mxu1 %v3996_v0  ;;  %3466 = vmatmul.mubr.f32.vlgmr.msra.gmra.mrb[0].mxu0 %v809_v29  ;;  %v270_v29 = vld [vmem:[#allocation5 + $0x628] sm:$0xff]  ;;  %v4164_v36 = vpack.c.bf16 %v228_v28, %v147_v26  ;;  %v4668_v56 = vld [vmem:[#allocation2 + $0x98] sm:$0xff]  ;;  %v353_v0 = vld [vmem:[#allocation5 + $0x8c0] sm:$0xff] }
 0x17d   :  { %4157 = vmatpush1.bf16.xpose.msra.mxu0 %v4156_v1  ;;  %3999 = vmatprep.subr.bf16.mxu1 %v3998_v2  ;;  %v4006_v37 = vpack.c.bf16 %v351_v30, %v270_v29  ;;  %v4672_v1 = vrot.slane %v4666_v53, %v4464_v21  ;;  %v312_v2 = vld [vmem:[#allocation5 + $0x778] sm:$0xff]  ;;  %v829_v25 = vcombine.high %v4668_v56, %v4668_v56  ;;  %v433_v26 = vld [vmem:[#allocation5 + $0xb40] sm:$0xff]  ;;  %v111_v29 = vld [vmem:[#allocation5 + $0x130] sm:$0xff] }
 0x17e   :  { %4159 = vmatprep.subr.bf16.mxu0 %v4158_v3  ;;  %2135 = vmatprep.mubr.f32.mxu1 %v657_v4  ;;  %v393_v3 = vld [vmem:[#allocation5 + $0xa00] sm:$0xff]  ;;  %v836_v4 = vrot.slane %v4668_v56, %v4464_v21  ;;  %v192_v30 = vld [vmem:[#allocation5 + $0x3b8] sm:$0xff]  ;;  %v234_v56 = vld [vmem:[#allocation5 + $0x508] sm:$0xff] }
 0x17f   :  { %3535 = vmatprep.mubr.f32.mxu0 %v827_v5  ;;  %v4012_v5 = vpack.c.bf16 %v190_v59, %v109_v58  ;;  %v4174_v8 = vpack.c.bf16 %v393_v3, %v312_v2  ;;  %v674_v9 = vcombine.high %v4672_v1, %v4672_v1  ;;  %v476_v52 = vld [vmem:[#allocation5 + $0xc98] sm:$0xff]  ;;  %v4404_v58 = vmov 0.0|0.0   ;;  %v3839_v3 = vld [vmem:[#allocation7] ss:$0 sm:$0xff] }
 0x180   :  { %v4406_v59 = vmov 0.0  }
 0x184   :  { %4001 = vmatpush1.bf16.xpose.msra.mxu1 %v4000_v10  ;;  %v844_v10 = vcombine.high %v836_v4, %v836_v4 }
 0x185   :  { %4161 = vmatpush1.bf16.xpose.msra.mxu0 %v4160_v11  ;;  %2079 = vmatprep.subr.mxu1 %v430_v12  ;;  %v271_v11 = vld [vmem:[#allocation5 + $0x630] sm:$0xff]  ;;  %v352_v12 = vld [vmem:[#allocation5 + $0x8b8] sm:$0xff] }
 0x186   :  { %3479 = vmatprep.subr.mxu0 %v470_v13  ;;  %v311_v13 = vld [vmem:[#allocation5 + $0x770] sm:$0xff]  ;;  %v4016_v15 = vpack.c.bf16 %v352_v12, %v271_v11 }
 0x187   :  { %v4176_v16 = vpack.c.bf16 %v392_v14, %v311_v13 }
 0x18c   :  { %2080 = vmatpush1.xpose.msra.mxu1 %v429_v20  ;;  %v193_v20 = vld [vmem:[#allocation5 + $0x3c0] sm:$0xff] }
 0x18d   :  { %3480 = vmatpush1.xpose.msra.mxu0 %v469_v22  ;;  %4003 = vmatprep.subr.bf16.mxu1 %v4002_v23  ;;  %v659_v22 = vcombine.high %v4666_v53, %v4666_v53  ;;  %v152_v23 = vld [vmem:[#allocation5 + $0x278] sm:$0xff]  ;;  %v4018_v28 = vpack.c.bf16 %v193_v20, %v112_v19  ;;  %v435_v53 = vld [vmem:[#allocation5 + $0xb50] sm:$0xff] }
 0x18e   :  { %4163 = vmatprep.subr.bf16.mxu0 %v4162_v27  ;;  %v473_v27 = vld [vmem:[#allocation5 + $0xc80] sm:$0xff]  ;;  %v4178_v32 = vpack.c.bf16 %v233_v24, %v152_v23 }
 0x18f   :  { %2136 = vmatmul.mubr.f32.vlgmr.msra.gmra.mrb[0].mxu1 %v4648_v60  ;;  %v149_v60 = vld [vmem:[#allocation5 + $0x260] sm:$0xff] }
 0x190   :  { %4005 = vmatpush1.bf16.xpose.msra.mxu1 %v4004_v35  ;;  %3536 = vmatmul.mubr.f32.vlgmr.msra.gmra.mrb[0].mxu0 %v819_v63  ;;  %v272_v63 = vld [vmem:[#allocation5 + $0x638] sm:$0xff]  ;;  %v4172_v6 = vpack.c.bf16 %v230_v62, %v149_v60  ;;  %v355_v35 = vld [vmem:[#allocation5 + $0x8d0] sm:$0xff] }
 0x191   :  { %4165 = vmatpush1.bf16.xpose.msra.mxu0 %v4164_v36  ;;  %4007 = vmatprep.subr.bf16.mxu1 %v4006_v37  ;;  %v4014_v7 = vpack.c.bf16 %v353_v0, %v272_v63  ;;  %v673_v36 = vrot.slane %v659_v22, %v4464_v21  ;;  %v314_v37 = vld [vmem:[#allocation5 + $0x788] sm:$0xff]  ;;  %v315_v60 = vld [vmem:[#allocation5 + $0x790] sm:$0xff]  ;;  %v477_v63 = vld [vmem:[#allocation5 + $0xca0] sm:$0xff] }
 0x192   :  { %4167 = vmatprep.subr.bf16.mxu0 %v4166_v38  ;;  %2205 = vmatprep.mubr.f32.mxu1 %v658_v39  ;;  %v395_v38 = vld [vmem:[#allocation5 + $0xa10] sm:$0xff]  ;;  %v843_v39 = vrot.slane %v829_v25, %v4464_v21  ;;  %v313_v21 = vld [vmem:[#allocation5 + $0x780] sm:$0xff]  ;;  %v3840_v0 = vld.sshfl [vmem:[#allocation2 + $0xa0] sm:$0x3 pattern:$0x76325410] }
 0x193   :  { %3605 = vmatprep.mubr.f32.mxu0 %v828_v40  ;;  %v4020_v40 = vpack.c.bf16 %v192_v30, %v111_v29  ;;  %v4182_v43 = vpack.c.bf16 %v395_v38, %v314_v37  ;;  %v675_v44 = vcombine.high %v673_v36, %v673_v36 }
 0x198   :  { %4009 = vmatpush1.bf16.xpose.msra.mxu1 %v4008_v45  ;;  %v845_v45 = vcombine.high %v843_v39, %v843_v39 }
 0x199   :  { %4169 = vmatpush1.bf16.xpose.msra.mxu0 %v4168_v46  ;;  %2149 = vmatprep.subr.mxu1 %v432_v47  ;;  %v273_v46 = vld [vmem:[#allocation5 + $0x640] sm:$0xff]  ;;  %v354_v47 = vld [vmem:[#allocation5 + $0x8c8] sm:$0xff] }
 0x19a   :  { %3549 = vmatprep.subr.mxu0 %v472_v48  ;;  %v394_v48 = vld [vmem:[#allocation5 + $0xa08] sm:$0xff]  ;;  %v4024_v49 = vpack.c.bf16 %v354_v47, %v273_v46 }
 0x19b   :  { %v4184_v50 = vpack.c.bf16 %v394_v48, %v313_v21 }
 0x1a0   :  { %2150 = vmatpush1.xpose.msra.mxu1 %v431_v54  ;;  %v475_v54 = vld [vmem:[#allocation5 + $0xc90] sm:$0xff] }
 0x1a1   :  { %3550 = vmatpush1.xpose.msra.mxu0 %v471_v55  ;;  %4011 = vmatprep.subr.bf16.mxu1 %v4010_v57  ;;  %v153_v55 = vld [vmem:[#allocation5 + $0x280] sm:$0xff] }
 0x1a2   :  { %4171 = vmatprep.subr.bf16.mxu0 %v4170_v61  ;;  %v4187_v57 = vpack.c.bf16 %v234_v56, %v153_v55  ;;  %v396_v61 = vld [vmem:[#allocation5 + $0xa18] sm:$0xff] }
 0x1a3   :  { %2206 = vmatmul.mubr.f32.vlgmr.msra.gmra.mrb[0].mxu1 %v4660_v31  ;;  %v151_v31 = vld [vmem:[#allocation5 + $0x270] sm:$0xff]  ;;  %v4191_v62 = vpack.c.bf16 %v396_v61, %v315_v60 }
 0x1a4   :  { %4013 = vmatpush1.bf16.xpose.msra.mxu1 %v4012_v5  ;;  %3606 = vmatmul.mubr.f32.vlgmr.msra.gmra.mrb[0].mxu0 %v826_v34  ;;  %v274_v34 = vld [vmem:[#allocation5 + $0x648] sm:$0xff]  ;;  %v4180_v41 = vpack.c.bf16 %v232_v33, %v151_v31 }
 0x1a5   :  { %4173 = vmatpush1.bf16.xpose.msra.mxu0 %v4172_v6  ;;  %4015 = vmatprep.subr.bf16.mxu1 %v4014_v7  ;;  %v4022_v42 = vpack.c.bf16 %v355_v35, %v274_v34 }
 0x1a6   :  { %4175 = vmatprep.subr.bf16.mxu0 %v4174_v8  ;;  %2275 = vmatprep.mubr.f32.mxu1 %v674_v9 }
 0x1a7   :  { %3675 = vmatprep.mubr.f32.mxu0 %v844_v10 }
 0x1ac   :  { %4017 = vmatpush1.bf16.xpose.msra.mxu1 %v4016_v15 }
 0x1ad   :  { %4177 = vmatpush1.bf16.xpose.msra.mxu0 %v4176_v16  ;;  %2219 = vmatprep.subr.mxu1 %v434_v17 }
 0x1ae   :  { %3619 = vmatprep.subr.mxu0 %v474_v18 }
 0x1b4   :  { %2220 = vmatpush1.xpose.msra.mxu1 %v433_v26 }
 0x1b5   :  { %3620 = vmatpush1.xpose.msra.mxu0 %v473_v27  ;;  %4019 = vmatprep.subr.bf16.mxu1 %v4018_v28 }
 0x1b6   :  { %4179 = vmatprep.subr.bf16.mxu0 %v4178_v32 }
 0x1b7   :  { %2276 = vmatmul.mubr.f32.vlgmr.msra.gmra.mrb[0].mxu1 %v4672_v1 }
 0x1b8   :  { %4021 = vmatpush1.bf16.xpose.msra.mxu1 %v4020_v40  ;;  %3676 = vmatmul.mubr.f32.vlgmr.msra.gmra.mrb[0].mxu0 %v836_v4 }
 0x1b9   :  { %4181 = vmatpush1.bf16.xpose.msra.mxu0 %v4180_v41  ;;  %4023 = vmatprep.subr.bf16.mxu1 %v4022_v42 }
 0x1ba   :  { %4183 = vmatprep.subr.bf16.mxu0 %v4182_v43  ;;  %2345 = vmatprep.mubr.f32.mxu1 %v675_v44 }
 0x1bb   :  { %3745 = vmatprep.mubr.f32.mxu0 %v845_v45 }
 0x1c0   :  { %4025 = vmatpush1.bf16.xpose.msra.mxu1 %v4024_v49 }
 0x1c1   :  { %4185 = vmatpush1.bf16.xpose.msra.mxu0 %v4184_v50  ;;  %2289 = vmatprep.subr.mxu1 %v436_v51 }
 0x1c2   :  { %3689 = vmatprep.subr.mxu0 %v476_v52 }
 0x1c8   :  { %2290 = vmatpush1.xpose.msra.mxu1 %v435_v53 }
 0x1c9   :  { %3690 = vmatpush1.xpose.msra.mxu0 %v475_v54 }
 0x1ca   :  { %4186 = vmatprep.subr.bf16.mxu0 %v4404_v58 }
 0x1cb   :  { %2346 = vmatmul.mubr.f32.vlgmr.msra.gmra.mrb[0].mxu1 %v673_v36 }
 0x1cc   :  { %3746 = vmatmul.mubr.f32.vlgmr.msra.gmra.mrb[0].mxu0 %v843_v39 }
 0x1cd   :  { %4189 = vmatpush3.bf16.xpose.msk.msra.mxu0 %vm4188_vm1, %v4187_v57  ;;  %3863 = vmatprep.mubr.msk.f32.mxu0 %vm4405_vm2, %v4406_v59 }
 0x1ce   :  { %4190 = vmatprep.subr.bf16.mxu0 %v4404_v58 }
 0x1d5   :  { %4193 = vmatpush3.bf16.xpose.msk.msra.mxu0 %vm4188_vm1, %v4191_v62 }
 0x1d6   :  { %3861 = vmatprep.subr.mxu0 %v4406_v59 }
 0x1dd   :  { %3862 = vmatpush3.xpose.msk.msra.mxu0 %vm933_vm0, %v477_v63 }
 0x1e0   :  { %3864 = vmatmul.mubr.msk.f32.vlgmr.msra.gmra.mrb[0].mxu0 %vm933_vm0, %v3840_v0 }
 0x29e   :  { %v2347_v1 = vpop.f32.mrb[0].mxu1 }
 0x29f   :  { %v2349_v2 = vpop.f32.mrb[1].mxu1  ;;  %v4194_v4 = vadd.f32 %v3839_v3, %v2347_v1 }
 0x2b3   :  { %v3817_v5 = vpop.f32.mrb[0].mxu0 }
 0x2b4   :  { %v4195_v6 = vadd.f32 %v4194_v4, %v3817_v5  ;;  %v3865_v7 = vpop.f32.mrb[1].mxu0 }
 0x2b6   :  { %3822 = vst.msk [vmem:[#allocation8] sm:$0x3] %vm3821_vm3, %v4195_v6 }
 0x2b7   :  { %4381 = shalt.err (!%p4378_p0)
}
 0x2b8   :  { %s4382_s26 = scalar_lea.hbm %s4705_s3, 32 }
 0x2b9   :  { %p4383_p1 = scmp.ne.s32.totalorder %s4705_s3, %s4382_s26  ;;  %p4386_p2 = scmp.lt.u32.totalorder %s4382_s26, %s4705_s3 }
 0x2bb   :  { %p4388_p3 = pnand %p4386_p2, %p4383_p1 }
 0x2bd   :  { %4391 = shalt.err (!%p4388_p3)
}
 0x2be   :  { %3832 = dma.vmem_to_hbm [thread:$0]  %s3830_s22, 32, %s4705_s3, [#allocation4]  }
 0x2bf   :  { %4396 = dma.done.wait [#allocation4], 32  }
 0x2c0   :  { %4397 = vsyncadd [#allocation4], 4294967264 }
 0x2c1   :  { %3836 = vsyncpa [#allocation3], 1 }
 0x2c2   :  { %3837 = vsyncpa [#allocation6], 1 }
 0x2c3   :  { %3838 = vsyncpa [#allocation4], 1 }

</bundles_post_ra>
